<compile_context>
chip_gen: v5e
topology: v5e:2x2
jax: 0.10.0
libtpu: 0.0.40
codegen_flags: <defaults>
</compile_context>

<pallas_src>
import functools

import jax
import jax.numpy as jnp
from jax import lax
from jax.experimental import pallas as pl
from jax.experimental.pallas import tpu as pltpu

VMEM = pl.BlockSpec(memory_space=pltpu.MemorySpace.VMEM)


# ------------------------------ fused kernel --------------------------------

def _fused_kernel(emb_ref, len_ref, wih_ref, whh_ref, b_ref,
                  wq_ref, bq_ref, wrrep_ref, pf_ref, out_ref,
                  *, T, Rp, Ru, Ri, D, H):
    """All shapes static (baked via closure).

    emb_ref  : (T*Rp, E) bf16  gathered word embeddings, time-major rows
    len_ref  : (Rp, 1)   i32   valid length per row (0 for pad rows)
    wih_ref  : (E, 4D)   bf16  LSTM input->gates weight, transposed (i,f,g,o)
    whh_ref  : (D, 4D)   f32   LSTM hidden->gates weight, transposed
    b_ref    : (1, 4D)   f32   b_ih + b_hh
    wq_ref   : (D, H*D)  f32   query_projection weight, transposed + permuted
                               to the (h*D + d) output layout
    bq_ref   : (1, H*D)  f32   query_projection bias (same permutation)
    wrrep_ref: (1, H*D)  f32   reduce_projection weight repeated: [h*D+d] = w_r[h]
    pf_ref   : (1, 1)    f32   personalized_factor
    out_ref  : (2, D)    f32   row 0 = personalized_model, row 1 = item_entity
    """
    # -- time-parallel input projection for ALL (t, row): bf16 MXU, f32 acc --
    gates_x = jnp.dot(emb_ref[...], wih_ref[...],
                      preferred_element_type=jnp.float32) + b_ref[...]   # (T*Rp, 4D)

    whh = whh_ref[...]
    lengths = len_ref[...]                                   # (Rp, 1) i32

    # -- batched LSTM recurrence, fully unrolled (T is static & tiny) --
    # TODO(synk): switch to lax.fori_loop + pl.ds slicing if T grows large/dynamic.
    h = jnp.zeros((Rp, D), jnp.float32)
    c = jnp.zeros((Rp, D), jnp.float32)
    for t in range(T):
        gates = gates_x[t * Rp:(t + 1) * Rp, :] + jnp.dot(
            h, whh, preferred_element_type=jnp.float32)      # (Rp, 4D)
        # 4D = 128 lanes here -> all gates share one vreg; full-width EUP is optimal.
        # (Only worth splitting i/f/o vs g activations if D >= 128.)
        sig = jax.nn.sigmoid(gates)
        tng = jnp.tanh(gates)
        i_g = sig[:, 0 * D:1 * D]
        f_g = sig[:, 1 * D:2 * D]
        g_g = tng[:, 2 * D:3 * D]
        o_g = sig[:, 3 * D:4 * D]
        c_new = f_g * c + i_g * g_g
        h_new = o_g * jnp.tanh(c_new)
        valid = t < lengths                                  # (Rp, 1) bool
        c = jnp.where(valid, c_new, c)                       # pad / finished rows keep state
        h = jnp.where(valid, h_new, h)

    rev = c                                                  # doc embeddings = c_n (cell state)
    q = rev[Ru + Ri:Ru + Ri + 1, :]                          # (1, D) query embedding

    # -- shared query projection (permuted (h*D+d) output layout) --
    qp = jnp.tanh(jnp.dot(q, wq_ref[...],
                          preferred_element_type=jnp.float32) + bq_ref[...])   # (1, H*D)

    # reduce_projection hoisted by associativity:
    #   s_row[d] = sum_h qp[h*D + d] * w_r[h]
    # done as a stride-D lane-group reduction (static lane slices + adds) —
    # no kron(I_D, w_r) weight, no M=1 MXU pass.
    t_vec = qp * wrrep_ref[...]                              # (1, H*D)
    s_row = t_vec[:, 0:D]
    for hh in range(1, H):
        s_row = s_row + t_vec[:, hh * D:(hh + 1) * D]        # (1, D)

    scores = jnp.sum(rev * s_row, axis=1, keepdims=True)     # (Rp, 1) == (rev @ pq) @ w_r

    ridx = lax.broadcasted_iota(jnp.int32, (Rp, 1), 0)

    def attend(mask):
        # NOTE: an all-masked group (Ru==0 or Ri==0) would give a degenerate softmax;
        # such configurations do not occur in this model.
        sc = jnp.where(mask, scores, -1e30)                  # mask other/pad rows
        m = jnp.max(sc, axis=0, keepdims=True)
        e = jnp.exp(sc - m)
        w = e / jnp.sum(e, axis=0, keepdims=True)            # exact softmax (torch parity)
        return jnp.sum(w * rev, axis=0, keepdims=True)       # (1, D)

    user_entity = attend(ridx < Ru)
    item_entity = attend(jnp.logical_and(ridx >= Ru, ridx < Ru + Ri))

    out_ref[0:1, :] = user_entity + pf_ref[...] * q          # personalized_model
    out_ref[1:2, :] = item_entity


# ------------------------------ JAX wrapper ----------------------------------

def model_forward(user_words, user_lens, item_words, item_lens,
                  query_words, params, mode="test"):
    if mode != "test":
        # TODO(synk): 'train' and 'output_embedding' modes reuse the same fused
        # kernel (add negative-item rows / drop user rows); only 'test' is wired up.
        raise NotImplementedError(mode)

    Ru, Tu = user_words.shape
    Ri, Ti = item_words.shape
    Tq = int(query_words.shape[0])
    T = max(Tu, Ti, Tq)
    R = Ru + Ri + 1
    Rp = max(8, -(-R // 8) * 8)                 # pad rows to a multiple of 8 sublanes

    D = params["whhT"].shape[0]
    H = params["wr"].shape[1]
    E = params["word_emb"].shape[1]

    # Pack user reviews, item reviews and the query into one padded batch.
    ids = jnp.zeros((Rp, T), jnp.int32)
    ids = ids.at[:Ru, :Tu].set(user_words.astype(jnp.int32))
    ids = ids.at[Ru:Ru + Ri, :Ti].set(item_words.astype(jnp.int32))
    ids = ids.at[Ru + Ri, :Tq].set(query_words.astype(jnp.int32))
    lens = jnp.zeros((Rp,), jnp.int32)
    lens = lens.at[:Ru].set(user_lens.astype(jnp.int32))
    lens = lens.at[Ru:Ru + Ri].set(item_lens.astype(jnp.int32))
    lens = lens.at[Ru + Ri].set(Tq)                           # len(query), as in the reference

    # Embedding gather OUTSIDE the kernel (XLA gather). Kernel inputs/cost are
    # now vocabulary-independent; bf16 slab halves HBM->VMEM bytes for the MXU.
    emb = jnp.take(params["word_emb"], ids, axis=0)           # (Rp, T, E) f32
    emb_tm = jnp.transpose(emb, (1, 0, 2)).reshape(T * Rp, E).astype(jnp.bfloat16)

    # Permute the query-projection output layout from (d*H + h) to (h*D + d) so
    # the reduce projection becomes a stride-D lane-group reduction in-kernel.
    wqT = params["wqT"]                                       # (D, D*H)
    wqT_perm = wqT.reshape(D, D, H).transpose(0, 2, 1).reshape(D, H * D)
    bq_perm = params["bq"].reshape(D, H).T.reshape(1, H * D)
    wr_rep = jnp.repeat(params["wr"].reshape(H), D).reshape(1, H * D)   # [h*D+d] = w_r[h]

    pf = params["personalized_factor"].astype(jnp.float32).reshape(1, 1)
    wih_bf16 = params["wihT"].astype(jnp.bfloat16)

    operands = (emb_tm, lens.reshape(Rp, 1), wih_bf16, params["whhT"],
                params["b_lstm"], wqT_perm, bq_perm, wr_rep, pf)

    # Scoped VMEM limit sized from the actual buffers (x2 headroom), clamped to
    # stay under the smallest physical VMEM (v7x: 64 MiB) with headroom.
    total_bytes = sum(int(x.size) * x.dtype.itemsize for x in operands) + 2 * D * 4
    vmem_limit = int(min(48 * 2 ** 20, max(16 * 2 ** 20, 2 * total_bytes + 4 * 2 ** 20)))

    kernel = functools.partial(_fused_kernel, T=T, Rp=Rp, Ru=Ru, Ri=Ri, D=D, H=H)
    out = pl.pallas_call(
        kernel,
        out_shape=jax.ShapeDtypeStruct((2, D), jnp.float32),
        in_specs=[VMEM] * len(operands),
        out_specs=VMEM,
        compiler_params=pltpu.CompilerParams(vmem_limit_bytes=vmem_limit),
    )(*operands)

    return out[0], out[1]                   # (personalized_model, item_entity), each (D,)


# ------------------------------ parameter init --------------------------------

def init_params(key, word_num, E, D, H):
    ks = jax.random.split(key, 10)
    word_emb = 0.01 * jax.random.normal(ks[0], (word_num, E), jnp.float32)
    word_emb = word_emb.at[0].set(0.0)                     # padding_idx = 0
    k_lstm = 1.0 / (D ** 0.5)                              # PyTorch LSTM default init
    w_ih = jax.random.uniform(ks[1], (4 * D, E), jnp.float32, -k_lstm, k_lstm)
    w_hh = jax.random.uniform(ks[2], (4 * D, D), jnp.float32, -k_lstm, k_lstm)
    b_ih = jax.random.uniform(ks[3], (4 * D,), jnp.float32, -k_lstm, k_lstm)
    b_hh = jax.random.uniform(ks[4], (4 * D,), jnp.float32, -k_lstm, k_lstm)
    std_q = (2.0 / (D + D * H)) ** 0.5                     # xavier_normal_
    wq = std_q * jax.random.normal(ks[5], (D * H, D), jnp.float32)
    bq = jax.random.uniform(ks[6], (D * H,), jnp.float32)  # uniform_ bias
    std_r = (2.0 / (H + 1)) ** 0.5                         # xavier_normal_
    wr = std_r * jax.random.normal(ks[7], (1, H), jnp.float32)
    personalized_factor = jax.random.uniform(ks[8], (1,), jnp.float32)
    gamma = jax.random.uniform(ks[9], (1,), jnp.float32)   # unused in forward
    return {
        "word_emb": word_emb,
        "wihT": jnp.asarray(w_ih.T),                       # (E, 4D)
        "whhT": jnp.asarray(w_hh.T),                       # (D, 4D)
        "b_lstm": (b_ih + b_hh).reshape(1, 4 * D),
        "wqT": jnp.asarray(wq.T),                          # (D, D*H)
        "bq": bq.reshape(1, D * H),
        "wr": wr,                                          # (1, H)
        "personalized_factor": personalized_factor,
        "gamma": gamma,
    }


# ----------------------------------- main --------------------------------------

if __name__ == "__main__":
    WORD_NUM, E, D, H = 50, 16, 32, 8       # word_num, word_emb, doc_emb, attn_hidden
    R_U, R_I, T, Q_LEN = 4, 4, 8, 6

    key = jax.random.PRNGKey(0)
    kp, kw1, kw2, kw3 = jax.random.split(key, 4)
    params = init_params(kp, WORD_NUM, E, D, H)

    user_lens = jnp.array([8, 5, 7, 3], jnp.int32)
    item_lens = jnp.array([6, 8, 4, 8], jnp.int32)
    user_words = jax.random.randint(kw1, (R_U, T), 1, WORD_NUM, jnp.int32)
    item_words = jax.random.randint(kw2, (R_I, T), 1, WORD_NUM, jnp.int32)
    t_idx = jnp.arange(T)[None, :]
    user_words = jnp.where(t_idx < user_lens[:, None], user_words, 0)   # pad with 0
    item_words = jnp.where(t_idx < item_lens[:, None], item_words, 0)
    query_words = jax.random.randint(kw3, (Q_LEN,), 1, WORD_NUM, jnp.int32)

    fwd = jax.jit(model_forward, static_argnames=("mode",))
    personalized, item_entity = fwd(
        user_words, user_lens, item_words, item_lens, query_words, params, mode="test")
    jax.block_until_ready((personalized, item_entity))

    assert personalized.shape == (D,) and item_entity.shape == (D,)
    assert bool(jnp.all(jnp.isfinite(personalized))) and bool(jnp.all(jnp.isfinite(item_entity)))
    print("KERNEL_OK")
</pallas_src>

<mosaic_0001>
module attributes {stable_mosaic.version = 11 : i64} {
  func.func @_fused_kernel(%arg0: memref<128x16xbf16, #tpu.memory_space<vmem>>, %arg1: memref<16x1xi32, #tpu.memory_space<vmem>>, %arg2: memref<16x128xbf16, #tpu.memory_space<vmem>>, %arg3: memref<32x128xf32, #tpu.memory_space<vmem>>, %arg4: memref<1x128xf32, #tpu.memory_space<vmem>>, %arg5: memref<32x256xf32, #tpu.memory_space<vmem>>, %arg6: memref<1x256xf32, #tpu.memory_space<vmem>>, %arg7: memref<1x256xf32, #tpu.memory_space<vmem>>, %arg8: memref<1x1xf32, #tpu.memory_space<vmem>>, %arg9: memref<2x32xf32, #tpu.memory_space<vmem>>) attributes {dimension_semantics = [], scalar_prefetch = 0 : i64, scratch_operands = 0 : i64, tpu.core_type = #tpu.core_type<tc>} {
    %c0 = arith.constant 0 : index
    %c0_0 = arith.constant 0 : index
    %0 = vector.load %arg0[%c0, %c0_0] : memref<128x16xbf16, #tpu.memory_space<vmem>>, vector<128x16xbf16>
    %c0_1 = arith.constant 0 : index
    %c0_2 = arith.constant 0 : index
    %1 = vector.load %arg2[%c0_1, %c0_2] : memref<16x128xbf16, #tpu.memory_space<vmem>>, vector<16x128xbf16>
    %cst = arith.constant dense<0.000000e+00> : vector<128x128xf32>
    %2 = tpu.matmul %0, %1, %cst {dimension_numbers = #tpu.dot_dimension_numbers<[1], [0], [0], [1], [0, 0, 1, 1], [], []>} : vector<128x16xbf16>, vector<16x128xbf16>, vector<128x128xf32> -> vector<128x128xf32>
    %c0_3 = arith.constant 0 : index
    %c0_4 = arith.constant 0 : index
    %3 = vector.load %arg4[%c0_3, %c0_4] : memref<1x128xf32, #tpu.memory_space<vmem>>, vector<1x128xf32>
    %4 = vector.broadcast %3 : vector<1x128xf32> to vector<128x128xf32>
    %5 = arith.addf %2, %4 : vector<128x128xf32>
    %c0_5 = arith.constant 0 : index
    %c0_6 = arith.constant 0 : index
    %6 = vector.load %arg3[%c0_5, %c0_6] : memref<32x128xf32, #tpu.memory_space<vmem>>, vector<32x128xf32>
    %c0_7 = arith.constant 0 : index
    %c0_8 = arith.constant 0 : index
    %7 = vector.load %arg1[%c0_7, %c0_8] : memref<16x1xi32, #tpu.memory_space<vmem>>, vector<16x1xi32>
    %cst_9 = arith.constant 0.000000e+00 : f32
    %8 = vector.broadcast %cst_9 : f32 to vector<16x32xf32>
    %cst_10 = arith.constant 0.000000e+00 : f32
    %9 = vector.broadcast %cst_10 : f32 to vector<16x32xf32>
    %10 = vector.extract_strided_slice %5 {offsets = [0, 0], sizes = [16, 128], strides = [1, 1]} : vector<128x128xf32> to vector<16x128xf32>
    %cst_11 = arith.constant dense<0.000000e+00> : vector<16x128xf32>
    %11 = tpu.matmul %8, %6, %cst_11 {dimension_numbers = #tpu.dot_dimension_numbers<[1], [0], [0], [1], [0, 0, 1, 1], [], []>} : vector<16x32xf32>, vector<32x128xf32>, vector<16x128xf32> -> vector<16x128xf32>
    %12 = arith.addf %10, %11 : vector<16x128xf32>
    %13 = arith.negf %12 : vector<16x128xf32>
    %14 = math.exp %13 : vector<16x128xf32>
    %cst_12 = arith.constant 1.000000e+00 : f32
    %15 = vector.broadcast %cst_12 : f32 to vector<16x128xf32>
    %16 = arith.addf %15, %14 : vector<16x128xf32>
    %17 = arith.divf %15, %16 : vector<16x128xf32>
    %18 = math.tanh %12 : vector<16x128xf32>
    %19 = vector.extract_strided_slice %17 {offsets = [0, 0], sizes = [16, 32], strides = [1, 1]} : vector<16x128xf32> to vector<16x32xf32>
    %20 = vector.extract_strided_slice %17 {offsets = [0, 32], sizes = [16, 32], strides = [1, 1]} : vector<16x128xf32> to vector<16x32xf32>
    %21 = vector.extract_strided_slice %18 {offsets = [0, 64], sizes = [16, 32], strides = [1, 1]} : vector<16x128xf32> to vector<16x32xf32>
    %22 = vector.extract_strided_slice %17 {offsets = [0, 96], sizes = [16, 32], strides = [1, 1]} : vector<16x128xf32> to vector<16x32xf32>
    %23 = arith.mulf %20, %9 : vector<16x32xf32>
    %24 = arith.mulf %19, %21 : vector<16x32xf32>
    %25 = arith.addf %23, %24 : vector<16x32xf32>
    %26 = math.tanh %25 : vector<16x32xf32>
    %27 = arith.mulf %22, %26 : vector<16x32xf32>
    %c0_i32 = arith.constant 0 : i32
    %28 = vector.broadcast %c0_i32 : i32 to vector<16x1xi32>
    %29 = arith.cmpi sgt, %7, %28 : vector<16x1xi32>
    %30 = vector.shape_cast %29 : vector<16x1xi1> to vector<16x1xi1>
    %31 = vector.broadcast %30 : vector<16x1xi1> to vector<16x32xi1>
    %32 = arith.select %31, %25, %9 : vector<16x32xi1>, vector<16x32xf32>
    %33 = vector.shape_cast %29 : vector<16x1xi1> to vector<16x1xi1>
    %34 = vector.broadcast %33 : vector<16x1xi1> to vector<16x32xi1>
    %35 = arith.select %34, %27, %8 : vector<16x32xi1>, vector<16x32xf32>
    %36 = vector.extract_strided_slice %5 {offsets = [16, 0], sizes = [16, 128], strides = [1, 1]} : vector<128x128xf32> to vector<16x128xf32>
    %cst_13 = arith.constant dense<0.000000e+00> : vector<16x128xf32>
    %37 = tpu.matmul %35, %6, %cst_13 {dimension_numbers = #tpu.dot_dimension_numbers<[1], [0], [0], [1], [0, 0, 1, 1], [], []>} : vector<16x32xf32>, vector<32x128xf32>, vector<16x128xf32> -> vector<16x128xf32>
    %38 = arith.addf %36, %37 : vector<16x128xf32>
    %39 = arith.negf %38 : vector<16x128xf32>
    %40 = math.exp %39 : vector<16x128xf32>
    %cst_14 = arith.constant 1.000000e+00 : f32
    %41 = vector.broadcast %cst_14 : f32 to vector<16x128xf32>
    %42 = arith.addf %41, %40 : vector<16x128xf32>
    %43 = arith.divf %41, %42 : vector<16x128xf32>
    %44 = math.tanh %38 : vector<16x128xf32>
    %45 = vector.extract_strided_slice %43 {offsets = [0, 0], sizes = [16, 32], strides = [1, 1]} : vector<16x128xf32> to vector<16x32xf32>
    %46 = vector.extract_strided_slice %43 {offsets = [0, 32], sizes = [16, 32], strides = [1, 1]} : vector<16x128xf32> to vector<16x32xf32>
    %47 = vector.extract_strided_slice %44 {offsets = [0, 64], sizes = [16, 32], strides = [1, 1]} : vector<16x128xf32> to vector<16x32xf32>
    %48 = vector.extract_strided_slice %43 {offsets = [0, 96], sizes = [16, 32], strides = [1, 1]} : vector<16x128xf32> to vector<16x32xf32>
    %49 = arith.mulf %46, %32 : vector<16x32xf32>
    %50 = arith.mulf %45, %47 : vector<16x32xf32>
    %51 = arith.addf %49, %50 : vector<16x32xf32>
    %52 = math.tanh %51 : vector<16x32xf32>
    %53 = arith.mulf %48, %52 : vector<16x32xf32>
    %c1_i32 = arith.constant 1 : i32
    %54 = vector.broadcast %c1_i32 : i32 to vector<16x1xi32>
    %55 = arith.cmpi sgt, %7, %54 : vector<16x1xi32>
    %56 = vector.shape_cast %55 : vector<16x1xi1> to vector<16x1xi1>
    %57 = vector.broadcast %56 : vector<16x1xi1> to vector<16x32xi1>
    %58 = arith.select %57, %51, %32 : vector<16x32xi1>, vector<16x32xf32>
    %59 = vector.shape_cast %55 : vector<16x1xi1> to vector<16x1xi1>
    %60 = vector.broadcast %59 : vector<16x1xi1> to vector<16x32xi1>
    %61 = arith.select %60, %53, %35 : vector<16x32xi1>, vector<16x32xf32>
    %62 = vector.extract_strided_slice %5 {offsets = [32, 0], sizes = [16, 128], strides = [1, 1]} : vector<128x128xf32> to vector<16x128xf32>
    %cst_15 = arith.constant dense<0.000000e+00> : vector<16x128xf32>
    %63 = tpu.matmul %61, %6, %cst_15 {dimension_numbers = #tpu.dot_dimension_numbers<[1], [0], [0], [1], [0, 0, 1, 1], [], []>} : vector<16x32xf32>, vector<32x128xf32>, vector<16x128xf32> -> vector<16x128xf32>
    %64 = arith.addf %62, %63 : vector<16x128xf32>
    %65 = arith.negf %64 : vector<16x128xf32>
    %66 = math.exp %65 : vector<16x128xf32>
    %cst_16 = arith.constant 1.000000e+00 : f32
    %67 = vector.broadcast %cst_16 : f32 to vector<16x128xf32>
    %68 = arith.addf %67, %66 : vector<16x128xf32>
    %69 = arith.divf %67, %68 : vector<16x128xf32>
    %70 = math.tanh %64 : vector<16x128xf32>
    %71 = vector.extract_strided_slice %69 {offsets = [0, 0], sizes = [16, 32], strides = [1, 1]} : vector<16x128xf32> to vector<16x32xf32>
    %72 = vector.extract_strided_slice %69 {offsets = [0, 32], sizes = [16, 32], strides = [1, 1]} : vector<16x128xf32> to vector<16x32xf32>
    %73 = vector.extract_strided_slice %70 {offsets = [0, 64], sizes = [16, 32], strides = [1, 1]} : vector<16x128xf32> to vector<16x32xf32>
    %74 = vector.extract_strided_slice %69 {offsets = [0, 96], sizes = [16, 32], strides = [1, 1]} : vector<16x128xf32> to vector<16x32xf32>
    %75 = arith.mulf %72, %58 : vector<16x32xf32>
    %76 = arith.mulf %71, %73 : vector<16x32xf32>
    %77 = arith.addf %75, %76 : vector<16x32xf32>
    %78 = math.tanh %77 : vector<16x32xf32>
    %79 = arith.mulf %74, %78 : vector<16x32xf32>
    %c2_i32 = arith.constant 2 : i32
    %80 = vector.broadcast %c2_i32 : i32 to vector<16x1xi32>
    %81 = arith.cmpi sgt, %7, %80 : vector<16x1xi32>
    %82 = vector.shape_cast %81 : vector<16x1xi1> to vector<16x1xi1>
    %83 = vector.broadcast %82 : vector<16x1xi1> to vector<16x32xi1>
    %84 = arith.select %83, %77, %58 : vector<16x32xi1>, vector<16x32xf32>
    %85 = vector.shape_cast %81 : vector<16x1xi1> to vector<16x1xi1>
    %86 = vector.broadcast %85 : vector<16x1xi1> to vector<16x32xi1>
    %87 = arith.select %86, %79, %61 : vector<16x32xi1>, vector<16x32xf32>
    %88 = vector.extract_strided_slice %5 {offsets = [48, 0], sizes = [16, 128], strides = [1, 1]} : vector<128x128xf32> to vector<16x128xf32>
    %cst_17 = arith.constant dense<0.000000e+00> : vector<16x128xf32>
    %89 = tpu.matmul %87, %6, %cst_17 {dimension_numbers = #tpu.dot_dimension_numbers<[1], [0], [0], [1], [0, 0, 1, 1], [], []>} : vector<16x32xf32>, vector<32x128xf32>, vector<16x128xf32> -> vector<16x128xf32>
    %90 = arith.addf %88, %89 : vector<16x128xf32>
    %91 = arith.negf %90 : vector<16x128xf32>
    %92 = math.exp %91 : vector<16x128xf32>
    %cst_18 = arith.constant 1.000000e+00 : f32
    %93 = vector.broadcast %cst_18 : f32 to vector<16x128xf32>
    %94 = arith.addf %93, %92 : vector<16x128xf32>
    %95 = arith.divf %93, %94 : vector<16x128xf32>
    %96 = math.tanh %90 : vector<16x128xf32>
    %97 = vector.extract_strided_slice %95 {offsets = [0, 0], sizes = [16, 32], strides = [1, 1]} : vector<16x128xf32> to vector<16x32xf32>
    %98 = vector.extract_strided_slice %95 {offsets = [0, 32], sizes = [16, 32], strides = [1, 1]} : vector<16x128xf32> to vector<16x32xf32>
    %99 = vector.extract_strided_slice %96 {offsets = [0, 64], sizes = [16, 32], strides = [1, 1]} : vector<16x128xf32> to vector<16x32xf32>
    %100 = vector.extract_strided_slice %95 {offsets = [0, 96], sizes = [16, 32], strides = [1, 1]} : vector<16x128xf32> to vector<16x32xf32>
    %101 = arith.mulf %98, %84 : vector<16x32xf32>
    %102 = arith.mulf %97, %99 : vector<16x32xf32>
    %103 = arith.addf %101, %102 : vector<16x32xf32>
    %104 = math.tanh %103 : vector<16x32xf32>
    %105 = arith.mulf %100, %104 : vector<16x32xf32>
    %c3_i32 = arith.constant 3 : i32
    %106 = vector.broadcast %c3_i32 : i32 to vector<16x1xi32>
    %107 = arith.cmpi sgt, %7, %106 : vector<16x1xi32>
    %108 = vector.shape_cast %107 : vector<16x1xi1> to vector<16x1xi1>
    %109 = vector.broadcast %108 : vector<16x1xi1> to vector<16x32xi1>
    %110 = arith.select %109, %103, %84 : vector<16x32xi1>, vector<16x32xf32>
    %111 = vector.shape_cast %107 : vector<16x1xi1> to vector<16x1xi1>
    %112 = vector.broadcast %111 : vector<16x1xi1> to vector<16x32xi1>
    %113 = arith.select %112, %105, %87 : vector<16x32xi1>, vector<16x32xf32>
    %114 = vector.extract_strided_slice %5 {offsets = [64, 0], sizes = [16, 128], strides = [1, 1]} : vector<128x128xf32> to vector<16x128xf32>
    %cst_19 = arith.constant dense<0.000000e+00> : vector<16x128xf32>
    %115 = tpu.matmul %113, %6, %cst_19 {dimension_numbers = #tpu.dot_dimension_numbers<[1], [0], [0], [1], [0, 0, 1, 1], [], []>} : vector<16x32xf32>, vector<32x128xf32>, vector<16x128xf32> -> vector<16x128xf32>
    %116 = arith.addf %114, %115 : vector<16x128xf32>
    %117 = arith.negf %116 : vector<16x128xf32>
    %118 = math.exp %117 : vector<16x128xf32>
    %cst_20 = arith.constant 1.000000e+00 : f32
    %119 = vector.broadcast %cst_20 : f32 to vector<16x128xf32>
    %120 = arith.addf %119, %118 : vector<16x128xf32>
    %121 = arith.divf %119, %120 : vector<16x128xf32>
    %122 = math.tanh %116 : vector<16x128xf32>
    %123 = vector.extract_strided_slice %121 {offsets = [0, 0], sizes = [16, 32], strides = [1, 1]} : vector<16x128xf32> to vector<16x32xf32>
    %124 = vector.extract_strided_slice %121 {offsets = [0, 32], sizes = [16, 32], strides = [1, 1]} : vector<16x128xf32> to vector<16x32xf32>
    %125 = vector.extract_strided_slice %122 {offsets = [0, 64], sizes = [16, 32], strides = [1, 1]} : vector<16x128xf32> to vector<16x32xf32>
    %126 = vector.extract_strided_slice %121 {offsets = [0, 96], sizes = [16, 32], strides = [1, 1]} : vector<16x128xf32> to vector<16x32xf32>
    %127 = arith.mulf %124, %110 : vector<16x32xf32>
    %128 = arith.mulf %123, %125 : vector<16x32xf32>
    %129 = arith.addf %127, %128 : vector<16x32xf32>
    %130 = math.tanh %129 : vector<16x32xf32>
    %131 = arith.mulf %126, %130 : vector<16x32xf32>
    %c4_i32 = arith.constant 4 : i32
    %132 = vector.broadcast %c4_i32 : i32 to vector<16x1xi32>
    %133 = arith.cmpi sgt, %7, %132 : vector<16x1xi32>
    %134 = vector.shape_cast %133 : vector<16x1xi1> to vector<16x1xi1>
    %135 = vector.broadcast %134 : vector<16x1xi1> to vector<16x32xi1>
    %136 = arith.select %135, %129, %110 : vector<16x32xi1>, vector<16x32xf32>
    %137 = vector.shape_cast %133 : vector<16x1xi1> to vector<16x1xi1>
    %138 = vector.broadcast %137 : vector<16x1xi1> to vector<16x32xi1>
    %139 = arith.select %138, %131, %113 : vector<16x32xi1>, vector<16x32xf32>
    %140 = vector.extract_strided_slice %5 {offsets = [80, 0], sizes = [16, 128], strides = [1, 1]} : vector<128x128xf32> to vector<16x128xf32>
    %cst_21 = arith.constant dense<0.000000e+00> : vector<16x128xf32>
    %141 = tpu.matmul %139, %6, %cst_21 {dimension_numbers = #tpu.dot_dimension_numbers<[1], [0], [0], [1], [0, 0, 1, 1], [], []>} : vector<16x32xf32>, vector<32x128xf32>, vector<16x128xf32> -> vector<16x128xf32>
    %142 = arith.addf %140, %141 : vector<16x128xf32>
    %143 = arith.negf %142 : vector<16x128xf32>
    %144 = math.exp %143 : vector<16x128xf32>
    %cst_22 = arith.constant 1.000000e+00 : f32
    %145 = vector.broadcast %cst_22 : f32 to vector<16x128xf32>
    %146 = arith.addf %145, %144 : vector<16x128xf32>
    %147 = arith.divf %145, %146 : vector<16x128xf32>
    %148 = math.tanh %142 : vector<16x128xf32>
    %149 = vector.extract_strided_slice %147 {offsets = [0, 0], sizes = [16, 32], strides = [1, 1]} : vector<16x128xf32> to vector<16x32xf32>
    %150 = vector.extract_strided_slice %147 {offsets = [0, 32], sizes = [16, 32], strides = [1, 1]} : vector<16x128xf32> to vector<16x32xf32>
    %151 = vector.extract_strided_slice %148 {offsets = [0, 64], sizes = [16, 32], strides = [1, 1]} : vector<16x128xf32> to vector<16x32xf32>
    %152 = vector.extract_strided_slice %147 {offsets = [0, 96], sizes = [16, 32], strides = [1, 1]} : vector<16x128xf32> to vector<16x32xf32>
    %153 = arith.mulf %150, %136 : vector<16x32xf32>
    %154 = arith.mulf %149, %151 : vector<16x32xf32>
    %155 = arith.addf %153, %154 : vector<16x32xf32>
    %156 = math.tanh %155 : vector<16x32xf32>
    %157 = arith.mulf %152, %156 : vector<16x32xf32>
    %c5_i32 = arith.constant 5 : i32
    %158 = vector.broadcast %c5_i32 : i32 to vector<16x1xi32>
    %159 = arith.cmpi sgt, %7, %158 : vector<16x1xi32>
    %160 = vector.shape_cast %159 : vector<16x1xi1> to vector<16x1xi1>
    %161 = vector.broadcast %160 : vector<16x1xi1> to vector<16x32xi1>
    %162 = arith.select %161, %155, %136 : vector<16x32xi1>, vector<16x32xf32>
    %163 = vector.shape_cast %159 : vector<16x1xi1> to vector<16x1xi1>
    %164 = vector.broadcast %163 : vector<16x1xi1> to vector<16x32xi1>
    %165 = arith.select %164, %157, %139 : vector<16x32xi1>, vector<16x32xf32>
    %166 = vector.extract_strided_slice %5 {offsets = [96, 0], sizes = [16, 128], strides = [1, 1]} : vector<128x128xf32> to vector<16x128xf32>
    %cst_23 = arith.constant dense<0.000000e+00> : vector<16x128xf32>
    %167 = tpu.matmul %165, %6, %cst_23 {dimension_numbers = #tpu.dot_dimension_numbers<[1], [0], [0], [1], [0, 0, 1, 1], [], []>} : vector<16x32xf32>, vector<32x128xf32>, vector<16x128xf32> -> vector<16x128xf32>
    %168 = arith.addf %166, %167 : vector<16x128xf32>
    %169 = arith.negf %168 : vector<16x128xf32>
    %170 = math.exp %169 : vector<16x128xf32>
    %cst_24 = arith.constant 1.000000e+00 : f32
    %171 = vector.broadcast %cst_24 : f32 to vector<16x128xf32>
    %172 = arith.addf %171, %170 : vector<16x128xf32>
    %173 = arith.divf %171, %172 : vector<16x128xf32>
    %174 = math.tanh %168 : vector<16x128xf32>
    %175 = vector.extract_strided_slice %173 {offsets = [0, 0], sizes = [16, 32], strides = [1, 1]} : vector<16x128xf32> to vector<16x32xf32>
    %176 = vector.extract_strided_slice %173 {offsets = [0, 32], sizes = [16, 32], strides = [1, 1]} : vector<16x128xf32> to vector<16x32xf32>
    %177 = vector.extract_strided_slice %174 {offsets = [0, 64], sizes = [16, 32], strides = [1, 1]} : vector<16x128xf32> to vector<16x32xf32>
    %178 = vector.extract_strided_slice %173 {offsets = [0, 96], sizes = [16, 32], strides = [1, 1]} : vector<16x128xf32> to vector<16x32xf32>
    %179 = arith.mulf %176, %162 : vector<16x32xf32>
    %180 = arith.mulf %175, %177 : vector<16x32xf32>
    %181 = arith.addf %179, %180 : vector<16x32xf32>
    %182 = math.tanh %181 : vector<16x32xf32>
    %183 = arith.mulf %178, %182 : vector<16x32xf32>
    %c6_i32 = arith.constant 6 : i32
    %184 = vector.broadcast %c6_i32 : i32 to vector<16x1xi32>
    %185 = arith.cmpi sgt, %7, %184 : vector<16x1xi32>
    %186 = vector.shape_cast %185 : vector<16x1xi1> to vector<16x1xi1>
    %187 = vector.broadcast %186 : vector<16x1xi1> to vector<16x32xi1>
    %188 = arith.select %187, %181, %162 : vector<16x32xi1>, vector<16x32xf32>
    %189 = vector.shape_cast %185 : vector<16x1xi1> to vector<16x1xi1>
    %190 = vector.broadcast %189 : vector<16x1xi1> to vector<16x32xi1>
    %191 = arith.select %190, %183, %165 : vector<16x32xi1>, vector<16x32xf32>
    %192 = vector.extract_strided_slice %5 {offsets = [112, 0], sizes = [16, 128], strides = [1, 1]} : vector<128x128xf32> to vector<16x128xf32>
    %cst_25 = arith.constant dense<0.000000e+00> : vector<16x128xf32>
    %193 = tpu.matmul %191, %6, %cst_25 {dimension_numbers = #tpu.dot_dimension_numbers<[1], [0], [0], [1], [0, 0, 1, 1], [], []>} : vector<16x32xf32>, vector<32x128xf32>, vector<16x128xf32> -> vector<16x128xf32>
    %194 = arith.addf %192, %193 : vector<16x128xf32>
    %195 = arith.negf %194 : vector<16x128xf32>
    %196 = math.exp %195 : vector<16x128xf32>
    %cst_26 = arith.constant 1.000000e+00 : f32
    %197 = vector.broadcast %cst_26 : f32 to vector<16x128xf32>
    %198 = arith.addf %197, %196 : vector<16x128xf32>
    %199 = arith.divf %197, %198 : vector<16x128xf32>
    %200 = math.tanh %194 : vector<16x128xf32>
    %201 = vector.extract_strided_slice %199 {offsets = [0, 0], sizes = [16, 32], strides = [1, 1]} : vector<16x128xf32> to vector<16x32xf32>
    %202 = vector.extract_strided_slice %199 {offsets = [0, 32], sizes = [16, 32], strides = [1, 1]} : vector<16x128xf32> to vector<16x32xf32>
    %203 = vector.extract_strided_slice %200 {offsets = [0, 64], sizes = [16, 32], strides = [1, 1]} : vector<16x128xf32> to vector<16x32xf32>
    %204 = arith.mulf %202, %188 : vector<16x32xf32>
    %205 = arith.mulf %201, %203 : vector<16x32xf32>
    %206 = arith.addf %204, %205 : vector<16x32xf32>
    %c7_i32 = arith.constant 7 : i32
    %207 = vector.broadcast %c7_i32 : i32 to vector<16x1xi32>
    %208 = arith.cmpi sgt, %7, %207 : vector<16x1xi32>
    %209 = vector.shape_cast %208 : vector<16x1xi1> to vector<16x1xi1>
    %210 = vector.broadcast %209 : vector<16x1xi1> to vector<16x32xi1>
    %211 = arith.select %210, %206, %188 : vector<16x32xi1>, vector<16x32xf32>
    %212 = vector.extract_strided_slice %211 {offsets = [8, 0], sizes = [1, 32], strides = [1, 1]} : vector<16x32xf32> to vector<1x32xf32>
    %c0_27 = arith.constant 0 : index
    %c0_28 = arith.constant 0 : index
    %213 = vector.load %arg5[%c0_27, %c0_28] : memref<32x256xf32, #tpu.memory_space<vmem>>, vector<32x256xf32>
    %cst_29 = arith.constant dense<0.000000e+00> : vector<1x256xf32>
    %214 = tpu.matmul %212, %213, %cst_29 {dimension_numbers = #tpu.dot_dimension_numbers<[1], [0], [0], [1], [0, 0, 1, 1], [], []>} : vector<1x32xf32>, vector<32x256xf32>, vector<1x256xf32> -> vector<1x256xf32>
    %c0_30 = arith.constant 0 : index
    %c0_31 = arith.constant 0 : index
    %215 = vector.load %arg6[%c0_30, %c0_31] : memref<1x256xf32, #tpu.memory_space<vmem>>, vector<1x256xf32>
    %216 = arith.addf %214, %215 : vector<1x256xf32>
    %217 = math.tanh %216 : vector<1x256xf32>
    %c0_32 = arith.constant 0 : index
    %c0_33 = arith.constant 0 : index
    %218 = vector.load %arg7[%c0_32, %c0_33] : memref<1x256xf32, #tpu.memory_space<vmem>>, vector<1x256xf32>
    %219 = arith.mulf %217, %218 : vector<1x256xf32>
    %220 = vector.extract_strided_slice %219 {offsets = [0, 0], sizes = [1, 32], strides = [1, 1]} : vector<1x256xf32> to vector<1x32xf32>
    %221 = vector.extract_strided_slice %219 {offsets = [0, 32], sizes = [1, 32], strides = [1, 1]} : vector<1x256xf32> to vector<1x32xf32>
    %222 = arith.addf %220, %221 : vector<1x32xf32>
    %223 = vector.extract_strided_slice %219 {offsets = [0, 64], sizes = [1, 32], strides = [1, 1]} : vector<1x256xf32> to vector<1x32xf32>
    %224 = arith.addf %222, %223 : vector<1x32xf32>
    %225 = vector.extract_strided_slice %219 {offsets = [0, 96], sizes = [1, 32], strides = [1, 1]} : vector<1x256xf32> to vector<1x32xf32>
    %226 = arith.addf %224, %225 : vector<1x32xf32>
    %227 = vector.extract_strided_slice %219 {offsets = [0, 128], sizes = [1, 32], strides = [1, 1]} : vector<1x256xf32> to vector<1x32xf32>
    %228 = arith.addf %226, %227 : vector<1x32xf32>
    %229 = vector.extract_strided_slice %219 {offsets = [0, 160], sizes = [1, 32], strides = [1, 1]} : vector<1x256xf32> to vector<1x32xf32>
    %230 = arith.addf %228, %229 : vector<1x32xf32>
    %231 = vector.extract_strided_slice %219 {offsets = [0, 192], sizes = [1, 32], strides = [1, 1]} : vector<1x256xf32> to vector<1x32xf32>
    %232 = arith.addf %230, %231 : vector<1x32xf32>
    %233 = vector.extract_strided_slice %219 {offsets = [0, 224], sizes = [1, 32], strides = [1, 1]} : vector<1x256xf32> to vector<1x32xf32>
    %234 = arith.addf %232, %233 : vector<1x32xf32>
    %235 = vector.broadcast %234 : vector<1x32xf32> to vector<16x32xf32>
    %236 = arith.mulf %211, %235 : vector<16x32xf32>
    %cst_34 = arith.constant dense<0.000000e+00> : vector<16xf32>
    %237 = vector.multi_reduction <add>, %236, %cst_34 [1] : vector<16x32xf32> to vector<16xf32>
    %238 = vector.shape_cast %237 : vector<16xf32> to vector<16x1xf32>
    %239 = tpu.iota {dimensions = array<i32: 0>} : vector<16x1xi32>
    %c4_i32_35 = arith.constant 4 : i32
    %240 = vector.broadcast %c4_i32_35 : i32 to vector<16x1xi32>
    %241 = arith.cmpi slt, %239, %240 : vector<16x1xi32>
    %cst_36 = arith.constant -1.000000e+30 : f32
    %242 = vector.broadcast %cst_36 : f32 to vector<16x1xf32>
    %243 = arith.select %241, %238, %242 : vector<16x1xi1>, vector<16x1xf32>
    %cst_37 = arith.constant dense<0xFF800000> : vector<1xf32>
    %244 = vector.multi_reduction <maximumf>, %243, %cst_37 [0] : vector<16x1xf32> to vector<1xf32>
    %245 = vector.shape_cast %244 : vector<1xf32> to vector<1x1xf32>
    %246 = vector.broadcast %245 : vector<1x1xf32> to vector<16x1xf32>
    %247 = arith.subf %243, %246 : vector<16x1xf32>
    %248 = math.exp %247 : vector<16x1xf32>
    %cst_38 = arith.constant dense<0.000000e+00> : vector<1xf32>
    %249 = vector.multi_reduction <add>, %248, %cst_38 [0] : vector<16x1xf32> to vector<1xf32>
    %250 = vector.shape_cast %249 : vector<1xf32> to vector<1x1xf32>
    %251 = vector.broadcast %250 : vector<1x1xf32> to vector<16x1xf32>
    %252 = arith.divf %248, %251 : vector<16x1xf32>
    %253 = vector.broadcast %252 : vector<16x1xf32> to vector<16x32xf32>
    %254 = arith.mulf %253, %211 : vector<16x32xf32>
    %cst_39 = arith.constant dense<0.000000e+00> : vector<32xf32>
    %255 = vector.multi_reduction <add>, %254, %cst_39 [0] : vector<16x32xf32> to vector<32xf32>
    %256 = vector.shape_cast %255 : vector<32xf32> to vector<1x32xf32>
    %c4_i32_40 = arith.constant 4 : i32
    %257 = vector.broadcast %c4_i32_40 : i32 to vector<16x1xi32>
    %258 = arith.cmpi sge, %239, %257 : vector<16x1xi32>
    %c8_i32 = arith.constant 8 : i32
    %259 = vector.broadcast %c8_i32 : i32 to vector<16x1xi32>
    %260 = arith.cmpi slt, %239, %259 : vector<16x1xi32>
    %261 = arith.andi %258, %260 : vector<16x1xi1>
    %cst_41 = arith.constant -1.000000e+30 : f32
    %262 = vector.broadcast %cst_41 : f32 to vector<16x1xf32>
    %263 = arith.select %261, %238, %262 : vector<16x1xi1>, vector<16x1xf32>
    %cst_42 = arith.constant dense<0xFF800000> : vector<1xf32>
    %264 = vector.multi_reduction <maximumf>, %263, %cst_42 [0] : vector<16x1xf32> to vector<1xf32>
    %265 = vector.shape_cast %264 : vector<1xf32> to vector<1x1xf32>
    %266 = vector.broadcast %265 : vector<1x1xf32> to vector<16x1xf32>
    %267 = arith.subf %263, %266 : vector<16x1xf32>
    %268 = math.exp %267 : vector<16x1xf32>
    %cst_43 = arith.constant dense<0.000000e+00> : vector<1xf32>
    %269 = vector.multi_reduction <add>, %268, %cst_43 [0] : vector<16x1xf32> to vector<1xf32>
    %270 = vector.shape_cast %269 : vector<1xf32> to vector<1x1xf32>
    %271 = vector.broadcast %270 : vector<1x1xf32> to vector<16x1xf32>
    %272 = arith.divf %268, %271 : vector<16x1xf32>
    %273 = vector.broadcast %272 : vector<16x1xf32> to vector<16x32xf32>
    %274 = arith.mulf %273, %211 : vector<16x32xf32>
    %cst_44 = arith.constant dense<0.000000e+00> : vector<32xf32>
    %275 = vector.multi_reduction <add>, %274, %cst_44 [0] : vector<16x32xf32> to vector<32xf32>
    %276 = vector.shape_cast %275 : vector<32xf32> to vector<1x32xf32>
    %c0_45 = arith.constant 0 : index
    %c0_46 = arith.constant 0 : index
    %277 = vector.load %arg8[%c0_45, %c0_46] : memref<1x1xf32, #tpu.memory_space<vmem>>, vector<1x1xf32>
    %278 = vector.broadcast %277 : vector<1x1xf32> to vector<1x32xf32>
    %279 = arith.mulf %278, %212 : vector<1x32xf32>
    %280 = arith.addf %256, %279 : vector<1x32xf32>
    %c0_47 = arith.constant 0 : index
    %c0_48 = arith.constant 0 : index
    %281 = vector.load %arg9[%c0_47, %c0_48] : memref<2x32xf32, #tpu.memory_space<vmem>>, vector<1x32xf32>
    tpu.vector_store %arg9[%c0_47, %c0_48], %280 {strides = array<i32>} : memref<2x32xf32, #tpu.memory_space<vmem>>, vector<1x32xf32>,
    %c1 = arith.constant 1 : index
    %c0_49 = arith.constant 0 : index
    %282 = vector.load %arg9[%c1, %c0_49] : memref<2x32xf32, #tpu.memory_space<vmem>>, vector<1x32xf32>
    tpu.vector_store %arg9[%c1, %c0_49], %276 {strides = array<i32>} : memref<2x32xf32, #tpu.memory_space<vmem>>, vector<1x32xf32>,
    return
  }
}

</mosaic_0001>

<bundles_post_ra>
// kernel: model_forward.1
= control target key start
LH: loop header
LB: loop body
LE: loop exit
PB: predicated region body
PF: predicated region fallthrough
CT: control target
= control target key end

     0   :  { %vm103_vm0 = vcmask 130048   ;;  %v1653_v7 = vmov 0.0   ;;  %s1654_s23 = smov 64   ;;  %v1655_v28 = vmov 0   ;;  %s1656_s24 = smov 32   ;;  %vm183_vm13 = vcmask 261120   ;;  %s2257_s2 = inlined_call_operand.vmem [shape: bf16[16,128], index: 2, kind: input, shape index: {}]   ;;  %s2258_s0 = inlined_call_operand.vmem [shape: bf16[128,16], index: 0, kind: input, shape index: {}]   ;;  %s2259_s3 = inlined_call_operand.vmem [shape: f32[32,128], index: 3, kind: input, shape index: {}]   ;;  %s2260_s4 = inlined_call_operand.vmem [shape: f32[1,128], index: 4, kind: input, shape index: {}]   ;;  %s2261_s1 = inlined_call_operand.vmem [shape: s32[16,1], index: 1, kind: input, shape index: {}]   ;;  %s2262_s5 = inlined_call_operand.vmem [shape: f32[32,256], index: 5, kind: input, shape index: {}]   ;;  %s2263_s6 = inlined_call_operand.vmem [shape: f32[1,256], index: 6, kind: input, shape index: {}]   ;;  %s2264_s7 = inlined_call_operand.vmem [shape: f32[1,256], index: 7, kind: input, shape index: {}]   ;;  %s2265_s8 = inlined_call_operand.<no memory space> [shape: f32[1,1], index: 8, kind: input, shape index: {}]   ;;  %s2266_s9 = inlined_call_operand.vmem [shape: f32[2,32], index: 9, kind: output, shape index: {}]  }
   0x1   :  { %v1498_v0 = vld [vmem:[%s2257_s2] sm:$0xff]  ;;  %v1714_v1 = vld [vmem:[%s2259_s3 + $0x18] sm:$0xff]  ;;  %v1495_v2 = vld [vmem:[%s2258_s0 + $0x28] sm:$0xff]  ;;  %1507 = vset.pattern.permute.xlu1 %v1655_v28  ;;  %1506 = vset.pattern.permute.xlu2 %v1655_v28  ;;  %s1657_s10 = smov 96  }
   0x2   :  { %v1490_v3 = vld [vmem:[%s2258_s0] sm:$0xff]  ;;  %449 = vmatpush.msra.mxu3 %v1714_v1  ;;  %1499 = vmatpush.bf16.msra.mxu1 %v1498_v0  ;;  %v1727_v4 = vld [vmem:[%s2259_s3 + $0x10] sm:$0xff]  ;;  %v1736_v5 = vld [vmem:[%s2259_s3 + $0x8] sm:$0xff] }
   0x3   :  { %135 = vmatpush.bf16.msra.mxu0 %v1498_v0  ;;  %1500 = vmatpush.bf16.msra.mxu2 %v1498_v0  ;;  %v1743_v6 = vld [vmem:[%s2259_s3] sm:$0xff]  ;;  %v1783_v52 = vld [vmem:[%s2261_s1 + $0x8] sm:$0xff] }
   0x4   :  { %450 = vmatpush.msra.mxu3 %v1727_v4  ;;  %v1770_v11 = vld [vmem:[%s2260_s4] ss:$0 sm:$0xff]  ;;  %1508 = vset.pattern.permute.xlu0 %v1655_v28  ;;  %vm287_vm9 = vcmp.gt.s32.totalorder %v1783_v52, 0 }
   0x5   :  { %1455 = vmatmul.msk.bf16.vlgmr.msra.gmra.mxu1 %vm103_vm0, %v1495_v2  ;;  %v289_v53 = vsel %vm287_vm9, 1, %v1655_v28  ;;  %v1796_v61 = vld [vmem:[%s2261_s1] sm:$0xff]  ;;  %v1496_v2 = vld [vmem:[%s2258_s0 + $0x30] sm:$0xff] }
   0x6   :  { %199 = vmatpush.msrb.mxu1 %v1714_v1  ;;  %1450 = vmatmul.msk.bf16.vlgmr.msra.gmra.mxu0 %vm103_vm0, %v1490_v3  ;;  %vm286_vm10 = vcmp.gt.s32.totalorder %v1796_v61, 0 }
   0x7   :  { %324 = vmatpush.msrb.mxu2 %v1714_v1  ;;  %451 = vmatpush.msra.mxu3 %v1736_v5  ;;  %v288_v62 = vsel %vm286_vm10, 1, %v1655_v28 }
   0x8   :  { %200 = vmatpush.msrb.mxu1 %v1727_v4  ;;  %1456 = vmatmul.msk.bf16.vlgmr.msra.gmra.mxu2 %vm103_vm0, %v1496_v2 }
   0x9   :  { %325 = vmatpush.msrb.mxu2 %v1727_v4  ;;  %452 = vmatpush.msra.mxu3 %v1743_v6 }
   0xa   :  { %201 = vmatpush.msrb.mxu1 %v1736_v5 }
   0xb   :  { %326 = vmatpush.msrb.mxu2 %v1736_v5  ;;  %824 = vmatpush.msrb.mxu3 %v1714_v1 }
   0xc   :  { %202 = vmatpush.msrb.mxu1 %v1743_v6 }
   0xd   :  { %327 = vmatpush.msrb.mxu2 %v1743_v6  ;;  %825 = vmatpush.msrb.mxu3 %v1727_v4 }
   0xe   :  { %574 = vmatpush.msra.mxu1 %v1714_v1 }
   0xf   :  { %826 = vmatpush.msrb.mxu3 %v1736_v5  ;;  %699 = vmatpush.msra.mxu2 %v1714_v1 }
  0x10   :  { %575 = vmatpush.msra.mxu1 %v1727_v4 }
  0x11   :  { %827 = vmatpush.msrb.mxu3 %v1743_v6  ;;  %700 = vmatpush.msra.mxu2 %v1727_v4 }
  0x12   :  { %576 = vmatpush.msra.mxu1 %v1736_v5 }
  0x13   :  { %701 = vmatpush.msra.mxu2 %v1736_v5 }
  0x14   :  { %577 = vmatpush.msra.mxu1 %v1743_v6 }
  0x15   :  { %203 = vmatmul.f32.vlgmr.msrb.gmra.mxu1 %v1653_v7  ;;  %702 = vmatpush.msra.mxu2 %v1743_v6 }
  0x16   :  { %949 = vmatpush.msrb.mxu1 %v1714_v1 }
  0x18   :  { %950 = vmatpush.msrb.mxu1 %v1727_v4 }
  0x1a   :  { %951 = vmatpush.msrb.mxu1 %v1736_v5 }
  0x1c   :  { %952 = vmatpush.msrb.mxu1 %v1743_v6 }
  0x1d   :  { %206 = vmatmul.f32.gmra.mxu1 %v1653_v7 }
  0x82   :  { %v1763_v8 = vpop.f32.mrf.mxu1 }
  0x83   :  { %v137_v10 = vpop.f32.mrf.mxu0 }
  0x84   :  { %v138_v12 = vadd.f32 %v1770_v11, %v137_v10 }
  0x8a   :  { %v1765_v9 = vpop.f32.mrf.mxu1 }
  0x8b   :  { %v139_v15 = vpop.f32.mrf.mxu0 }
  0x8c   :  { %v140_v16 = vadd.f32 %v1770_v11, %v139_v15 }
  0x92   :  { %v204_v13 = vpop.f32.mrf.mxu1 }
  0x93   :  { %v210_v14 = vadd.f32 %v204_v13, %v138_v12  ;;  %v1497_v12 = vld [vmem:[%s2258_s0 + $0x38] sm:$0xff] }
  0x94   :  { %1457 = vmatmul.msk.bf16.gmra.mxu2 %vm103_vm0, %v1497_v12 }
  0x95   :  { %1510 = vtanh.f32 %v210_v14  ;;  %v1458_v21 = vmul.f32 -1.442695, %v210_v14 }
  0x9a   :  { %v207_v17 = vpop.f32.mrf.mxu1 }
  0x9b   :  { %v1511_v18 = vpop.eup %1510  ;;  %v211_v19 = vadd.f32 %v207_v17, %v140_v16  ;;  %v1491_v17 = vld [vmem:[%s2258_s0 + $0x8] sm:$0xff] }
  0x9c   :  { %256 = vrot.lane.b32.xlu0 %v1511_v18, %s1654_s23  ;;  %1451 = vmatmul.msk.bf16.gmra.mxu0 %vm103_vm0, %v1491_v17 }
  0x9d   :  { %1512 = vtanh.f32 %v211_v19  ;;  %v1459_v22 = vmul.f32 -1.442695, %v211_v19 }
  0x9e   :  { %1514 = vpow2.f32 %v1458_v21 }
  0x9f   :  { %1516 = vpow2.f32 %v1459_v22 }
  0xa3   :  { %v1513_v20 = vpop.eup %1512 }
  0xa4   :  { %258 = vrot.lane.b32.xlu0 %v1513_v20, %s1654_s23  ;;  %v1515_v23 = vpop.eup %1514  ;;  %v1843_v20 = vpop.f32.mrf.mxu2 }
  0xa5   :  { %v218_v24 = vadd.f32 1.0, %v1515_v23  ;;  %v1517_v25 = vpop.eup %1516 }
  0xa6   :  { %v219_v26 = vadd.f32 1.0, %v1517_v25 }
  0xa7   :  { %1518 = vrcp.f32 %v218_v24  ;;  %v231_v36 = vand.u32 2147483648, %v218_v24  ;;  %vm225_vm2 = vweird.f32 %v218_v24  ;;  %v229_v37 = vand.u32 2147483647, %v218_v24 }
  0xa8   :  { %1520 = vrcp.f32 %v219_v26  ;;  %v246_v45 = vand.u32 2147483648, %v219_v26  ;;  %vm240_vm6 = vweird.f32 %v219_v26  ;;  %v244_v46 = vand.u32 2147483647, %v219_v26 }
  0xa9   :  { %v232_v40 = vor.u32 1.1754944e-38, %v231_v36  ;;  %vm230_vm4 = vcmp.eq.f32.partialorder %v229_v37, 8.507059e+37 }
  0xaa   :  { %v247_v48 = vor.u32 1.1754944e-38, %v246_v45  ;;  %vm245_vm8 = vcmp.eq.f32.partialorder %v244_v46, 8.507059e+37 }
  0xac   :  { %v1845_v21 = vpop.f32.mrf.mxu2 }
  0xad   :  { %v1519_v27 = vpop.eup %1518 }
  0xae   :  { %v221_v29 = vmul.f32 %v1519_v27, %v218_v24  ;;  %v1521_v31 = vpop.eup %1520  ;;  %vm226_vm1 = vweird.f32 %v1519_v27 }
  0xaf   :  { %v236_v33 = vmul.f32 %v1521_v31, %v219_v26  ;;  %vm227_vm3 = vmor %vm225_vm2, %vm226_vm1  ;;  %vm241_vm5 = vweird.f32 %v1521_v31 }
  0xb0   :  { %v222_v30 = vsub.f32 1.0, %v221_v29  ;;  %vm242_vm7 = vmor %vm240_vm6, %vm241_vm5 }
  0xb1   :  { %v237_v35 = vsub.f32 1.0, %v236_v33 }
  0xb2   :  { %v223_v32 = vmul.f32 %v1519_v27, %v222_v30 }
  0xb3   :  { %v238_v39 = vmul.f32 %v1521_v31, %v237_v35 }
  0xb4   :  { %v224_v34 = vadd.f32 %v1519_v27, %v223_v32 }
  0xb5   :  { %v239_v44 = vadd.f32 %v1521_v31, %v238_v39 }
  0xb6   :  { %v228_v38 = vsel %vm227_vm3, %v1519_v27, %v224_v34  ;;  %vm411_vm3 = vcmp.gt.s32.totalorder %v1796_v61, 1 }
  0xb7   :  { %v233_v42 = vsel %vm230_vm4, %v232_v40, %v228_v38  ;;  %v243_v47 = vsel %vm242_vm7, %v1521_v31, %v239_v44 }
  0xb8   :  { %v248_v49 = vsel %vm245_vm8, %v247_v48, %v243_v47  ;;  %v252_v54 = vmul.f32 0.0, %v233_v42  ;;  %vm412_vm8 = vcmp.gt.s32.totalorder %v1783_v52, 1 }
  0xb9   :  { %v253_v57 = vmul.f32 0.0, %v248_v49 }
 0x10e   :  { %v257_v41 = vpop.permute.xlu0 %256 }
 0x10f   :  { %v262_v43 = vmul.f32 %v257_v41, %v233_v42 }
 0x111   :  { %266 = vrot.lane.b32.xlu1 %v262_v43, %s1656_s24 }
 0x116   :  { %v259_v50 = vpop.permute.xlu0 %258 }
 0x117   :  { %v263_v51 = vmul.f32 %v259_v50, %v248_v49  ;;  %v1847_v22 = vpop.f32.mrf.mxu2 }
 0x119   :  { %268 = vrot.lane.b32.xlu1 %v263_v51, %s1656_s24  ;;  %v142_v24 = vpop.f32.mrf.mxu0  ;;  %v413_v51 = vsel %vm411_vm3, 1, %v1655_v28 }
 0x11f   :  { %v1849_v23 = vpop.f32.mrf.mxu2 }
 0x121   :  { %294 = vperm.xlu1 %1507, %v289_v53  }
 0x183   :  { %v267_v55 = vpop.permute.xlu1 %266 }
 0x184   :  { %v1788_v56 = vadd.f32 %v267_v55, %v252_v54 }
 0x186   :  { %1522 = vtanh.f32 %v1788_v56 }
 0x18b   :  { %v269_v58 = vpop.permute.xlu1 %268 }
 0x18c   :  { %v1523_v59 = vpop.eup %1522  ;;  %v1791_v60 = vadd.f32 %v269_v58, %v253_v57 }
 0x18d   :  { %278 = vrot.lane.b32.xlu2 %v1523_v59, %s1654_s23 }
 0x18e   :  { %1524 = vtanh.f32 %v1791_v60 }
 0x193   :  { %v1824_v13 = vpop.permute.xlu1 %294 }
 0x194   :  { %v1525_v63 = vpop.eup %1524  ;;  %vm297_vm12 = vcmp.eq.s32.totalorder %v1824_v13, 1 }
 0x195   :  { %280 = vrot.lane.b32.xlu0 %v1525_v63, %s1654_s23  ;;  %291 = vperm.xlu2 %1506, %v288_v62  }
 0x1e7   :  { %v279_v0 = vpop.permute.xlu2 %278 }
 0x1e8   :  { %v284_v3 = vmul.f32 %v279_v0, %v233_v42 }
 0x1ef   :  { %v1808_v7 = vpop.permute.xlu2 %291 }
 0x1f0   :  { %vm296_vm11 = vcmp.eq.s32.totalorder %v1808_v7, 1 }
 0x1f1   :  { %v1814_v10 = vsel %vm296_vm11, %v284_v3, 0.0  ;;  %v1862_v3 = vsel %vm296_vm11, %v1788_v56, 0.0  ;;  %v1874_v56 = vsel %vm297_vm12, %v1791_v60, 0.0 }
 0x1f2   :  { %304 = vrot.lane.b32.xlu2 %v1814_v10, %s1656_s24 }
 0x207   :  { %v281_v14 = vpop.permute.xlu0 %280 }
 0x208   :  { %v285_v15 = vmul.f32 %v281_v14, %v248_v49 }
 0x20a   :  { %v1829_v16 = vsel %vm297_vm12, %v285_v15, 0.0 }
 0x20b   :  { %306 = vrot.lane.b32.xlu0 %v1829_v16, %s1656_s24 }
 0x24c   :  { %v305_v18 = vpop.permute.xlu2 %304 }
 0x24d   :  { %1460 = vmatmul.msk.f32.vlgmr.msrb.gmra.mxu2 %vm183_vm13, %v305_v18  ;;  %v414_v18 = vsel %vm412_vm8, 1, %v1655_v28 }
 0x24e   :  { %1074 = vmatpush.msrb.mxu2 %v1714_v1  ;;  %v143_v1 = vadd.f32 %v1770_v11, %v142_v24 }
 0x250   :  { %1075 = vmatpush.msrb.mxu2 %v1727_v4 }
 0x252   :  { %1076 = vmatpush.msrb.mxu2 %v1736_v5 }
 0x254   :  { %1077 = vmatpush.msrb.mxu2 %v1743_v6  ;;  %v144_v6 = vpop.f32.mrf.mxu0 }
 0x255   :  { %v145_v26 = vadd.f32 %v1770_v11, %v144_v6 }
 0x27d   :  { %v307_v19 = vpop.permute.xlu0 %306 }
 0x27e   :  { %1461 = vmatmul.msk.f32.gmra.mxu2 %vm183_vm13, %v307_v19 }
 0x2d0   :  { %v329_v25 = vpop.f32.mrf.mxu2 }
 0x2d1   :  { %v335_v4 = vadd.f32 %v329_v25, %v143_v1 }
 0x2d3   :  { %1526 = vtanh.f32 %v335_v4  ;;  %v1462_v31 = vmul.f32 -1.442695, %v335_v4 }
 0x2d9   :  { %v1527_v5 = vpop.eup %1526 }
 0x2da   :  { %381 = vrot.lane.b32.xlu1 %v1527_v5, %s1654_s23 }
 0x301   :  { %v332_v27 = vpop.f32.mrf.mxu2 }
 0x302   :  { %v336_v29 = vadd.f32 %v332_v27, %v145_v26 }
 0x304   :  { %1528 = vtanh.f32 %v336_v29  ;;  %v1463_v35 = vmul.f32 -1.442695, %v336_v29 }
 0x305   :  { %1530 = vpow2.f32 %v1462_v31 }
 0x30a   :  { %v1529_v30 = vpop.eup %1528 }
 0x30b   :  { %383 = vrot.lane.b32.xlu2 %v1529_v30, %s1654_s23  ;;  %v1531_v32 = vpop.eup %1530 }
 0x30c   :  { %v343_v33 = vadd.f32 1.0, %v1531_v32 }
 0x30e   :  { %1532 = vrcp.f32 %v343_v33  ;;  %v356_v42 = vand.u32 2147483648, %v343_v33  ;;  %vm350_vm15 = vweird.f32 %v343_v33  ;;  %v354_v43 = vand.u32 2147483647, %v343_v33 }
 0x30f   :  { %1534 = vpow2.f32 %v1463_v35 }
 0x310   :  { %v357_v45 = vor.u32 1.1754944e-38, %v356_v42  ;;  %vm355_vm2 = vcmp.eq.f32.partialorder %v354_v43, 8.507059e+37 }
 0x314   :  { %v1533_v34 = vpop.eup %1532 }
 0x315   :  { %v346_v36 = vmul.f32 %v1533_v34, %v343_v33  ;;  %v1535_v39 = vpop.eup %1534  ;;  %vm351_vm14 = vweird.f32 %v1533_v34 }
 0x316   :  { %v344_v40 = vadd.f32 1.0, %v1535_v39  ;;  %vm352_vm1 = vmor %vm350_vm15, %vm351_vm14 }
 0x317   :  { %v347_v37 = vsub.f32 1.0, %v346_v36 }
 0x318   :  { %1536 = vrcp.f32 %v344_v40  ;;  %v371_v57 = vand.u32 2147483648, %v344_v40  ;;  %vm365_vm5 = vweird.f32 %v344_v40  ;;  %v369_v58 = vand.u32 2147483647, %v344_v40 }
 0x319   :  { %v348_v38 = vmul.f32 %v1533_v34, %v347_v37 }
 0x31a   :  { %v372_v62 = vor.u32 1.1754944e-38, %v371_v57  ;;  %vm370_vm7 = vcmp.eq.f32.partialorder %v369_v58, 8.507059e+37 }
 0x31b   :  { %v349_v41 = vadd.f32 %v1533_v34, %v348_v38 }
 0x31d   :  { %v353_v44 = vsel %vm352_vm1, %v1533_v34, %v349_v41  ;;  %vm536_vm1 = vcmp.gt.s32.totalorder %v1796_v61, 2 }
 0x31e   :  { %v358_v47 = vsel %vm355_vm2, %v357_v45, %v353_v44  ;;  %v1537_v49 = vpop.eup %1536 }
 0x31f   :  { %v361_v50 = vmul.f32 %v1537_v49, %v344_v40  ;;  %vm366_vm4 = vweird.f32 %v1537_v49  ;;  %v377_v12 = vmul.f32 %v358_v47, %v1862_v3 }
 0x320   :  { %vm367_vm6 = vmor %vm365_vm5, %vm366_vm4 }
 0x321   :  { %v362_v53 = vsub.f32 1.0, %v361_v50 }
 0x323   :  { %v363_v54 = vmul.f32 %v1537_v49, %v362_v53 }
 0x325   :  { %v364_v55 = vadd.f32 %v1537_v49, %v363_v54 }
 0x327   :  { %v368_v59 = vsel %vm367_vm6, %v1537_v49, %v364_v55  ;;  %vm537_vm6 = vcmp.gt.s32.totalorder %v1783_v52, 2 }
 0x328   :  { %v373_v0 = vsel %vm370_vm7, %v372_v62, %v368_v59 }
 0x329   :  { %v378_v7 = vmul.f32 %v373_v0, %v1874_v56 }
 0x34c   :  { %v382_v46 = vpop.permute.xlu1 %381 }
 0x34d   :  { %v387_v48 = vmul.f32 %v382_v46, %v358_v47 }
 0x34f   :  { %391 = vrot.lane.b32.xlu0 %v387_v48, %s1656_s24 }
 0x357   :  { %416 = vperm.xlu0 %1508, %v413_v51  }
 0x365   :  { %v384_v63 = vpop.permute.xlu2 %383 }
 0x366   :  { %v388_v2 = vmul.f32 %v384_v63, %v373_v0 }
 0x368   :  { %393 = vrot.lane.b32.xlu1 %v388_v2, %s1656_s24 }
 0x3c1   :  { %v392_v14 = vpop.permute.xlu0 %391 }
 0x3c2   :  { %v1865_v15 = vadd.f32 %v392_v14, %v377_v12 }
 0x3c4   :  { %1538 = vtanh.f32 %v1865_v15 }
 0x3c9   :  { %v1881_v25 = vpop.permute.xlu0 %416 }
 0x3ca   :  { %v1539_v17 = vpop.eup %1538  ;;  %vm421_vm9 = vcmp.eq.s32.totalorder %v1881_v25, 1 }
 0x3cb   :  { %403 = vrot.lane.b32.xlu2 %v1539_v17, %s1654_s23 }
 0x3d3   :  { %419 = vperm.xlu2 %1506, %v414_v18  }
 0x3da   :  { %v394_v19 = vpop.permute.xlu1 %393 }
 0x3db   :  { %v1877_v24 = vadd.f32 %v394_v19, %v378_v7 }
 0x3dd   :  { %1540 = vtanh.f32 %v1877_v24 }
 0x3e3   :  { %v1541_v1 = vpop.eup %1540 }
 0x3e4   :  { %405 = vrot.lane.b32.xlu1 %v1541_v1, %s1654_s23 }
 0x425   :  { %v404_v4 = vpop.permute.xlu2 %403 }
 0x426   :  { %v409_v5 = vmul.f32 %v404_v4, %v358_v47 }
 0x428   :  { %v1887_v60 = vsel %vm421_vm9, %v409_v5, %v1814_v10  ;;  %v1492_v10 = vld [vmem:[%s2258_s0 + $0x10] sm:$0xff] }
 0x429   :  { %429 = vrot.lane.b32.xlu1 %v1887_v60, %s1656_s24  ;;  %1452 = vmatmul.msk.bf16.gmra.mxu0 %vm103_vm0, %v1492_v10 }
 0x42d   :  { %v1891_v13 = vpop.permute.xlu2 %419 }
 0x42e   :  { %vm422_vm10 = vcmp.eq.s32.totalorder %v1891_v13, 1 }
 0x456   :  { %v406_v6 = vpop.permute.xlu1 %405 }
 0x457   :  { %v410_v26 = vmul.f32 %v406_v6, %v373_v0  ;;  %v538_v0 = vsel %vm536_vm1, 1, %v1655_v28  ;;  %v1919_v6 = vsel %vm421_vm9, %v1865_v15, %v1862_v3  ;;  %v1932_v3 = vsel %vm422_vm10, %v1877_v24, %v1874_v56  ;;  %v1493_v24 = vld [vmem:[%s2258_s0 + $0x18] sm:$0xff] }
 0x458   :  { %1453 = vmatmul.msk.bf16.gmra.mxu0 %vm103_vm0, %v1493_v24 }
 0x459   :  { %v1897_v27 = vsel %vm422_vm10, %v410_v26, %v1829_v16 }
 0x45a   :  { %431 = vrot.lane.b32.xlu2 %v1897_v27, %s1656_s24 }
 0x49b   :  { %v430_v29 = vpop.permute.xlu1 %429 }
 0x49c   :  { %1464 = vmatmul.msk.f32.vlgmr.msra.gmra.mxu3 %vm183_vm13, %v430_v29 }
 0x4a6   :  { %v147_v31 = vpop.f32.mrf.mxu0 }
 0x4a7   :  { %v148_v32 = vadd.f32 %v1770_v11, %v147_v31  ;;  %v539_v31 = vsel %vm537_vm6, 1, %v1655_v28 }
 0x4ae   :  { %v149_v35 = vpop.f32.mrf.mxu0 }
 0x4af   :  { %v150_v36 = vadd.f32 %v1770_v11, %v149_v35 }
 0x4b4   :  { %v432_v30 = vpop.permute.xlu2 %431 }
 0x4b5   :  { %1465 = vmatmul.msk.f32.gmra.mxu3 %vm183_vm13, %v432_v30 }
 0x51f   :  { %v454_v16 = vpop.f32.mrf.mxu3 }
 0x520   :  { %v460_v33 = vadd.f32 %v454_v16, %v148_v32 }
 0x522   :  { %1542 = vtanh.f32 %v460_v33  ;;  %v1466_v40 = vmul.f32 -1.442695, %v460_v33 }
 0x528   :  { %v1543_v34 = vpop.eup %1542 }
 0x529   :  { %506 = vrot.lane.b32.xlu0 %v1543_v34, %s1654_s23 }
 0x538   :  { %v457_v37 = vpop.f32.mrf.mxu3 }
 0x539   :  { %v461_v38 = vadd.f32 %v457_v37, %v150_v36 }
 0x53b   :  { %1544 = vtanh.f32 %v461_v38  ;;  %v1467_v44 = vmul.f32 -1.442695, %v461_v38 }
 0x53c   :  { %1546 = vpow2.f32 %v1466_v40  ;;  %v152_v40 = vpop.f32.mrf.mxu0 }
 0x541   :  { %v1545_v39 = vpop.eup %1544 }
 0x542   :  { %508 = vrot.lane.b32.xlu1 %v1545_v39, %s1654_s23  ;;  %v1547_v41 = vpop.eup %1546 }
 0x543   :  { %v468_v42 = vadd.f32 1.0, %v1547_v41  ;;  %v153_v41 = vadd.f32 %v1770_v11, %v152_v40 }
 0x545   :  { %1548 = vrcp.f32 %v468_v42  ;;  %v481_v51 = vand.u32 2147483648, %v468_v42  ;;  %vm475_vm12 = vweird.f32 %v468_v42  ;;  %v479_v53 = vand.u32 2147483647, %v468_v42 }
 0x546   :  { %1550 = vpow2.f32 %v1467_v44 }
 0x547   :  { %v482_v55 = vor.u32 1.1754944e-38, %v481_v51  ;;  %vm480_vm15 = vcmp.eq.f32.partialorder %v479_v53, 8.507059e+37 }
 0x54b   :  { %v1549_v43 = vpop.eup %1548 }
 0x54c   :  { %v471_v45 = vmul.f32 %v1549_v43, %v468_v42  ;;  %v1551_v48 = vpop.eup %1550  ;;  %vm476_vm11 = vweird.f32 %v1549_v43 }
 0x54d   :  { %v469_v49 = vadd.f32 1.0, %v1551_v48  ;;  %vm477_vm14 = vmor %vm475_vm12, %vm476_vm11 }
 0x54e   :  { %v472_v46 = vsub.f32 1.0, %v471_v45 }
 0x54f   :  { %1552 = vrcp.f32 %v469_v49  ;;  %v496_v17 = vand.u32 2147483648, %v469_v49  ;;  %vm490_vm3 = vweird.f32 %v469_v49  ;;  %v494_v18 = vand.u32 2147483647, %v469_v49 }
 0x550   :  { %v473_v47 = vmul.f32 %v1549_v43, %v472_v46 }
 0x551   :  { %v497_v19 = vor.u32 1.1754944e-38, %v496_v17  ;;  %vm495_vm5 = vcmp.eq.f32.partialorder %v494_v18, 8.507059e+37 }
 0x552   :  { %v474_v50 = vadd.f32 %v1549_v43, %v473_v47 }
 0x554   :  { %v478_v54 = vsel %vm477_vm14, %v1549_v43, %v474_v50  ;;  %vm661_vm14 = vcmp.gt.s32.totalorder %v1796_v61, 3 }
 0x555   :  { %v483_v58 = vsel %vm480_vm15, %v482_v55, %v478_v54  ;;  %v1553_v62 = vpop.eup %1552  ;;  %v663_v18 = vsel %vm661_vm14, 1, %v1655_v28 }
 0x556   :  { %v486_v63 = vmul.f32 %v1553_v62, %v469_v49  ;;  %vm491_vm2 = vweird.f32 %v1553_v62  ;;  %v502_v26 = vmul.f32 %v483_v58, %v1919_v6 }
 0x557   :  { %vm492_vm4 = vmor %vm490_vm3, %vm491_vm2 }
 0x558   :  { %v487_v2 = vsub.f32 1.0, %v486_v63 }
 0x55a   :  { %v488_v12 = vmul.f32 %v1553_v62, %v487_v2 }
 0x55c   :  { %v489_v14 = vadd.f32 %v1553_v62, %v488_v12 }
 0x55e   :  { %v493_v7 = vsel %vm492_vm4, %v1553_v62, %v489_v14  ;;  %vm662_vm4 = vcmp.gt.s32.totalorder %v1783_v52, 3 }
 0x55f   :  { %v498_v4 = vsel %vm495_vm5, %v497_v19, %v493_v7  ;;  %v664_v40 = vsel %vm662_vm4, 1, %v1655_v28 }
 0x560   :  { %v503_v15 = vmul.f32 %v498_v4, %v1932_v3 }
 0x59b   :  { %v507_v57 = vpop.permute.xlu0 %506 }
 0x59c   :  { %v512_v59 = vmul.f32 %v507_v57, %v483_v58 }
 0x59e   :  { %516 = vrot.lane.b32.xlu2 %v512_v59, %s1656_s24 }
 0x5a6   :  { %541 = vperm.xlu2 %1506, %v538_v0  }
 0x5b4   :  { %v509_v1 = vpop.permute.xlu1 %508 }
 0x5b5   :  { %v513_v5 = vmul.f32 %v509_v1, %v498_v4 }
 0x5b7   :  { %518 = vrot.lane.b32.xlu0 %v513_v5, %s1656_s24 }
 0x5f8   :  { %v517_v10 = vpop.permute.xlu2 %516 }
 0x5f9   :  { %v1922_v29 = vadd.f32 %v517_v10, %v502_v26 }
 0x5fb   :  { %1554 = vtanh.f32 %v1922_v29 }
 0x600   :  { %v1939_v33 = vpop.permute.xlu2 %541 }
 0x601   :  { %v1555_v30 = vpop.eup %1554  ;;  %vm546_vm7 = vcmp.eq.s32.totalorder %v1939_v33, 1 }
 0x602   :  { %528 = vrot.lane.b32.xlu1 %v1555_v30, %s1654_s23  ;;  %v1977_v24 = vsel %vm546_vm7, %v1922_v29, %v1919_v6 }
 0x60a   :  { %544 = vperm.xlu1 %1507, %v539_v31  }
 0x629   :  { %v519_v25 = vpop.permute.xlu0 %518 }
 0x62a   :  { %v1935_v32 = vadd.f32 %v519_v25, %v503_v15 }
 0x62c   :  { %1556 = vtanh.f32 %v1935_v32 }
 0x632   :  { %v1557_v16 = vpop.eup %1556 }
 0x633   :  { %530 = vrot.lane.b32.xlu0 %v1557_v16, %s1654_s23 }
 0x674   :  { %v529_v34 = vpop.permute.xlu1 %528 }
 0x675   :  { %v534_v35 = vmul.f32 %v529_v34, %v483_v58 }
 0x677   :  { %v1945_v56 = vsel %vm546_vm7, %v534_v35, %v1887_v60 }
 0x678   :  { %554 = vrot.lane.b32.xlu2 %v1945_v56, %s1656_s24 }
 0x67c   :  { %v1953_v13 = vpop.permute.xlu1 %544 }
 0x67d   :  { %vm547_vm8 = vcmp.eq.s32.totalorder %v1953_v13, 1 }
 0x67e   :  { %v1990_v6 = vsel %vm547_vm8, %v1935_v32, %v1932_v3 }
 0x6a5   :  { %v531_v36 = vpop.permute.xlu0 %530 }
 0x6a6   :  { %v535_v37 = vmul.f32 %v531_v36, %v498_v4 }
 0x6a8   :  { %v1959_v60 = vsel %vm547_vm8, %v535_v37, %v1897_v27  ;;  %v154_v27 = vpop.f32.mrf.mxu0 }
 0x6a9   :  { %556 = vrot.lane.b32.xlu0 %v1959_v60, %s1656_s24  ;;  %v155_v45 = vadd.f32 %v1770_v11, %v154_v27 }
 0x6d2   :  { %v555_v38 = vpop.permute.xlu2 %554 }
 0x6d3   :  { %1468 = vmatmul.msk.f32.vlgmr.msra.gmra.mxu1 %vm183_vm13, %v555_v38 }
 0x71b   :  { %v557_v39 = vpop.permute.xlu0 %556 }
 0x71c   :  { %1469 = vmatmul.msk.f32.gmra.mxu1 %vm183_vm13, %v557_v39 }
 0x750   :  { %v579_v42 = vpop.f32.mrf.mxu1 }
 0x751   :  { %v585_v43 = vadd.f32 %v579_v42, %v153_v41 }
 0x753   :  { %1558 = vtanh.f32 %v585_v43  ;;  %v1470_v48 = vmul.f32 -1.442695, %v585_v43 }
 0x759   :  { %v1559_v44 = vpop.eup %1558 }
 0x75a   :  { %631 = vrot.lane.b32.xlu1 %v1559_v44, %s1654_s23 }
 0x799   :  { %v582_v46 = vpop.f32.mrf.mxu1 }
 0x79a   :  { %v586_v47 = vadd.f32 %v582_v46, %v155_v45 }
 0x79c   :  { %1560 = vtanh.f32 %v586_v47  ;;  %v1471_v17 = vmul.f32 -1.442695, %v586_v47 }
 0x79d   :  { %1562 = vpow2.f32 %v1470_v48 }
 0x7a2   :  { %v1561_v49 = vpop.eup %1560 }
 0x7a3   :  { %633 = vrot.lane.b32.xlu2 %v1561_v49, %s1654_s23  ;;  %v1563_v50 = vpop.eup %1562 }
 0x7a4   :  { %v593_v51 = vadd.f32 1.0, %v1563_v50 }
 0x7a6   :  { %1564 = vrcp.f32 %v593_v51  ;;  %v606_v59 = vand.u32 2147483648, %v593_v51  ;;  %vm600_vm10 = vweird.f32 %v593_v51  ;;  %v604_v62 = vand.u32 2147483647, %v593_v51 }
 0x7a7   :  { %1566 = vpow2.f32 %v1471_v17 }
 0x7a8   :  { %v607_v0 = vor.u32 1.1754944e-38, %v606_v59  ;;  %vm605_vm12 = vcmp.eq.f32.partialorder %v604_v62, 8.507059e+37 }
 0x7ac   :  { %v1565_v53 = vpop.eup %1564 }
 0x7ad   :  { %v596_v54 = vmul.f32 %v1565_v53, %v593_v51  ;;  %vm601_vm9 = vweird.f32 %v1565_v53  ;;  %v1567_v7 = vpop.eup %1566 }
 0x7ae   :  { %vm602_vm11 = vmor %vm600_vm10, %vm601_vm9  ;;  %v594_v19 = vadd.f32 1.0, %v1567_v7  ;;  %vm786_vm10 = vcmp.gt.s32.totalorder %v1796_v61, 4 }
 0x7af   :  { %v597_v55 = vsub.f32 1.0, %v596_v54 }
 0x7b0   :  { %1568 = vrcp.f32 %v594_v19  ;;  %v621_v30 = vand.u32 2147483648, %v594_v19  ;;  %vm615_vm1 = vweird.f32 %v594_v19  ;;  %v619_v31 = vand.u32 2147483647, %v594_v19 }
 0x7b1   :  { %v598_v57 = vmul.f32 %v1565_v53, %v597_v55 }
 0x7b2   :  { %v622_v25 = vor.u32 1.1754944e-38, %v621_v30  ;;  %vm620_vm3 = vcmp.eq.f32.partialorder %v619_v31, 8.507059e+37  ;;  %v788_v30 = vsel %vm786_vm10, 1, %v1655_v28 }
 0x7b3   :  { %v599_v58 = vadd.f32 %v1565_v53, %v598_v57 }
 0x7b5   :  { %v603_v63 = vsel %vm602_vm11, %v1565_v53, %v599_v58 }
 0x7b6   :  { %v608_v12 = vsel %vm605_vm12, %v607_v0, %v603_v63  ;;  %v1569_v1 = vpop.eup %1568 }
 0x7b7   :  { %v611_v4 = vmul.f32 %v1569_v1, %v594_v19  ;;  %vm616_vm15 = vweird.f32 %v1569_v1  ;;  %v627_v36 = vmul.f32 %v608_v12, %v1977_v24 }
 0x7b8   :  { %vm617_vm2 = vmor %vm615_vm1, %vm616_vm15  ;;  %vm787_vm1 = vcmp.gt.s32.totalorder %v1783_v52, 4 }
 0x7b9   :  { %v612_v5 = vsub.f32 1.0, %v611_v4 }
 0x7bb   :  { %v613_v26 = vmul.f32 %v1569_v1, %v612_v5 }
 0x7bd   :  { %v614_v10 = vadd.f32 %v1569_v1, %v613_v26 }
 0x7bf   :  { %v618_v15 = vsel %vm617_vm2, %v1569_v1, %v614_v10 }
 0x7c0   :  { %v623_v34 = vsel %vm620_vm3, %v622_v25, %v618_v15 }
 0x7c1   :  { %v628_v29 = vmul.f32 %v623_v34, %v1990_v6 }
 0x7cc   :  { %v632_v2 = vpop.permute.xlu1 %631 }
 0x7cd   :  { %v637_v14 = vmul.f32 %v632_v2, %v608_v12 }
 0x7cf   :  { %641 = vrot.lane.b32.xlu0 %v637_v14, %s1656_s24 }
 0x7d7   :  { %666 = vperm.xlu0 %1508, %v663_v18  }
 0x7fd   :  { %v634_v16 = vpop.permute.xlu2 %633 }
 0x7fe   :  { %v638_v35 = vmul.f32 %v634_v16, %v623_v34 }
 0x800   :  { %643 = vrot.lane.b32.xlu1 %v638_v35, %s1656_s24 }
 0x841   :  { %v642_v37 = vpop.permute.xlu0 %641 }
 0x842   :  { %v1980_v38 = vadd.f32 %v642_v37, %v627_v36 }
 0x844   :  { %1570 = vtanh.f32 %v1980_v38 }
 0x849   :  { %v1997_v43 = vpop.permute.xlu0 %666 }
 0x84a   :  { %v1571_v39 = vpop.eup %1570  ;;  %vm671_vm5 = vcmp.eq.s32.totalorder %v1997_v43, 1 }
 0x84b   :  { %653 = vrot.lane.b32.xlu2 %v1571_v39, %s1654_s23 }
 0x853   :  { %669 = vperm.xlu2 %1506, %v664_v40  }
 0x872   :  { %v644_v33 = vpop.permute.xlu1 %643 }
 0x873   :  { %v1993_v41 = vadd.f32 %v644_v33, %v628_v29 }
 0x875   :  { %1572 = vtanh.f32 %v1993_v41 }
 0x87b   :  { %v1573_v42 = vpop.eup %1572 }
 0x87c   :  { %655 = vrot.lane.b32.xlu1 %v1573_v42, %s1654_s23 }
 0x8a5   :  { %v654_v44 = vpop.permute.xlu2 %653 }
 0x8a6   :  { %v659_v27 = vmul.f32 %v654_v44, %v608_v12 }
 0x8a8   :  { %v2003_v3 = vsel %vm671_vm5, %v659_v27, %v1945_v56  ;;  %v1494_v56 = vld [vmem:[%s2258_s0 + $0x20] sm:$0xff] }
 0x8a9   :  { %679 = vrot.lane.b32.xlu0 %v2003_v3, %s1656_s24  ;;  %1454 = vmatmul.msk.bf16.gmra.mxu0 %vm103_vm0, %v1494_v56 }
 0x8ad   :  { %v2007_v32 = vpop.permute.xlu2 %669 }
 0x8ae   :  { %vm672_vm6 = vcmp.eq.s32.totalorder %v2007_v32, 1 }
 0x8ee   :  { %v656_v13 = vpop.permute.xlu1 %655 }
 0x8ef   :  { %v660_v45 = vmul.f32 %v656_v13, %v623_v34  ;;  %v2035_v13 = vsel %vm671_vm5, %v1980_v38, %v1977_v24  ;;  %v674_v24 = vsel %vm672_vm6, %v1993_v41, %v1990_v6 }
 0x8f1   :  { %v2013_v46 = vsel %vm672_vm6, %v660_v45, %v1959_v60 }
 0x8f2   :  { %681 = vrot.lane.b32.xlu1 %v2013_v46, %s1656_s24 }
 0x91b   :  { %v680_v47 = vpop.permute.xlu0 %679 }
 0x91c   :  { %1472 = vmatmul.msk.f32.vlgmr.msra.gmra.mxu2 %vm183_vm13, %v680_v47 }
 0x926   :  { %v157_v49 = vpop.f32.mrf.mxu0 }
 0x927   :  { %v158_v50 = vadd.f32 %v1770_v11, %v157_v49  ;;  %v789_v49 = vsel %vm787_vm1, 1, %v1655_v28 }
 0x92e   :  { %v159_v58 = vpop.f32.mrf.mxu0 }
 0x92f   :  { %v160_v59 = vadd.f32 %v1770_v11, %v159_v58 }
 0x964   :  { %v682_v48 = vpop.permute.xlu1 %681 }
 0x965   :  { %1473 = vmatmul.msk.f32.gmra.mxu2 %vm183_vm13, %v682_v48 }
 0x99f   :  { %v704_v60 = vpop.f32.mrf.mxu2 }
 0x9a0   :  { %v710_v51 = vadd.f32 %v704_v60, %v158_v50 }
 0x9a2   :  { %1574 = vtanh.f32 %v710_v51  ;;  %v1474_v54 = vmul.f32 -1.442695, %v710_v51 }
 0x9a4   :  { %1576 = vpow2.f32 %v1474_v54 }
 0x9a8   :  { %v1575_v53 = vpop.eup %1574 }
 0x9a9   :  { %756 = vrot.lane.b32.xlu2 %v1575_v53, %s1654_s23 }
 0x9aa   :  { %v1577_v55 = vpop.eup %1576 }
 0x9ab   :  { %v718_v57 = vadd.f32 1.0, %v1577_v55 }
 0x9ad   :  { %1578 = vrcp.f32 %v718_v57  ;;  %v731_v7 = vand.u32 2147483648, %v718_v57  ;;  %vm725_vm7 = vweird.f32 %v718_v57  ;;  %v729_v19 = vand.u32 2147483647, %v718_v57 }
 0x9af   :  { %v732_v4 = vor.u32 1.1754944e-38, %v731_v7  ;;  %vm730_vm9 = vcmp.eq.f32.partialorder %v729_v19, 8.507059e+37 }
 0x9b3   :  { %v1579_v0 = vpop.eup %1578 }
 0x9b4   :  { %v721_v2 = vmul.f32 %v1579_v0, %v718_v57  ;;  %vm726_vm0 = vweird.f32 %v1579_v0 }
 0x9b5   :  { %vm727_vm8 = vmor %vm725_vm7, %vm726_vm0  ;;  %vm911_vm7 = vcmp.gt.s32.totalorder %v1796_v61, 5 }
 0x9b6   :  { %v722_v14 = vsub.f32 1.0, %v721_v2 }
 0x9b8   :  { %v723_v17 = vmul.f32 %v1579_v0, %v722_v14 }
 0x9ba   :  { %v724_v18 = vadd.f32 %v1579_v0, %v723_v17 }
 0x9bc   :  { %v728_v1 = vsel %vm727_vm8, %v1579_v0, %v724_v18 }
 0x9bd   :  { %v733_v26 = vsel %vm730_vm9, %v732_v4, %v728_v1 }
 0x9be   :  { %v752_v45 = vmul.f32 %v733_v26, %v2035_v13 }
 0x9e8   :  { %v707_v62 = vpop.f32.mrf.mxu2 }
 0x9e9   :  { %v711_v63 = vadd.f32 %v707_v62, %v160_v59  ;;  %v163_v62 = vadd.f32 %v1770_v11, %v1763_v8 }
 0x9eb   :  { %1580 = vtanh.f32 %v711_v63  ;;  %v1475_v31 = vmul.f32 -1.442695, %v711_v63 }
 0x9ed   :  { %1582 = vpow2.f32 %v1475_v31 }
 0x9f1   :  { %v1581_v12 = vpop.eup %1580 }
 0x9f2   :  { %758 = vrot.lane.b32.xlu0 %v1581_v12, %s1654_s23 }
 0x9f3   :  { %v1583_v15 = vpop.eup %1582 }
 0x9f4   :  { %v719_v25 = vadd.f32 1.0, %v1583_v15 }
 0x9f6   :  { %1584 = vrcp.f32 %v719_v25  ;;  %v746_v39 = vand.u32 2147483648, %v719_v25  ;;  %vm740_vm12 = vweird.f32 %v719_v25  ;;  %v744_v40 = vand.u32 2147483647, %v719_v25 }
 0x9f8   :  { %v747_v33 = vor.u32 1.1754944e-38, %v746_v39  ;;  %vm745_vm15 = vcmp.eq.f32.partialorder %v744_v40, 8.507059e+37  ;;  %v913_v39 = vsel %vm911_vm7, 1, %v1655_v28 }
 0x9fc   :  { %v1585_v16 = vpop.eup %1584 }
 0x9fd   :  { %v736_v34 = vmul.f32 %v1585_v16, %v719_v25  ;;  %vm741_vm11 = vweird.f32 %v1585_v16 }
 0x9fe   :  { %vm742_vm14 = vmor %vm740_vm12, %vm741_vm11  ;;  %vm912_vm12 = vcmp.gt.s32.totalorder %v1783_v52, 5 }
 0x9ff   :  { %v737_v35 = vsub.f32 1.0, %v736_v34 }
 0xa01   :  { %v738_v36 = vmul.f32 %v1585_v16, %v737_v35 }
 0xa03   :  { %v757_v5 = vpop.permute.xlu2 %756  ;;  %v739_v37 = vadd.f32 %v1585_v16, %v738_v36 }
 0xa04   :  { %v762_v10 = vmul.f32 %v757_v5, %v733_v26 }
 0xa05   :  { %v743_v29 = vsel %vm742_vm14, %v1585_v16, %v739_v37 }
 0xa06   :  { %766 = vrot.lane.b32.xlu1 %v762_v10, %s1656_s24  ;;  %v748_v44 = vsel %vm745_vm15, %v747_v33, %v743_v29 }
 0xa07   :  { %v753_v38 = vmul.f32 %v748_v44, %v674_v24 }
 0xa0e   :  { %791 = vperm.xlu1 %1507, %v788_v30  }
 0xa64   :  { %v759_v42 = vpop.permute.xlu0 %758 }
 0xa65   :  { %v763_v27 = vmul.f32 %v759_v42, %v748_v44 }
 0xa67   :  { %768 = vrot.lane.b32.xlu2 %v763_v27, %s1656_s24 }
 0xa78   :  { %v767_v56 = vpop.permute.xlu1 %766 }
 0xa79   :  { %v2038_v47 = vadd.f32 %v767_v56, %v752_v45 }
 0xa7b   :  { %1586 = vtanh.f32 %v2038_v47 }
 0xa80   :  { %v2049_v51 = vpop.permute.xlu1 %791 }
 0xa81   :  { %v1587_v48 = vpop.eup %1586  ;;  %vm796_vm2 = vcmp.eq.s32.totalorder %v2049_v51, 1 }
 0xa82   :  { %778 = vrot.lane.b32.xlu0 %v1587_v48, %s1654_s23  ;;  %v2082_v61 = vsel %vm796_vm2, %v2038_v47, %v2035_v13 }
 0xa8a   :  { %794 = vperm.xlu0 %1508, %v789_v49  }
 0xac1   :  { %v769_v43 = vpop.permute.xlu2 %768 }
 0xac2   :  { %v773_v50 = vadd.f32 %v769_v43, %v753_v38 }
 0xac4   :  { %1588 = vtanh.f32 %v773_v50 }
 0xaca   :  { %v1589_v60 = vpop.eup %1588 }
 0xacb   :  { %780 = vrot.lane.b32.xlu2 %v1589_v60, %s1654_s23  ;;  %v914_v60 = vsel %vm912_vm12, 1, %v1655_v28 }
 0xaf4   :  { %v779_v53 = vpop.permute.xlu0 %778 }
 0xaf5   :  { %v784_v54 = vmul.f32 %v779_v53, %v733_v26 }
 0xaf7   :  { %v2055_v55 = vsel %vm796_vm2, %v784_v54, %v2003_v3 }
 0xaf8   :  { %804 = vrot.lane.b32.xlu1 %v2055_v55, %s1656_s24 }
 0xafc   :  { %v795_v6 = vpop.permute.xlu0 %794 }
 0xafd   :  { %vm797_vm3 = vcmp.eq.s32.totalorder %v795_v6, 1 }
 0xafe   :  { %v2059_v41 = vsel %vm797_vm3, %v773_v50, %v674_v24 }
 0xb25   :  { %v781_v32 = vpop.permute.xlu2 %780 }
 0xb26   :  { %v785_v57 = vmul.f32 %v781_v32, %v748_v44 }
 0xb28   :  { %v2062_v58 = vsel %vm797_vm3, %v785_v57, %v2013_v46  ;;  %v165_v46 = vadd.f32 %v1770_v11, %v1765_v9 }
 0xb29   :  { %806 = vrot.lane.b32.xlu2 %v2062_v58, %s1656_s24 }
 0xb6a   :  { %v805_v59 = vpop.permute.xlu1 %804 }
 0xb6b   :  { %1476 = vmatmul.msk.f32.vlgmr.msrb.gmra.mxu3 %vm183_vm13, %v805_v59 }
 0xb83   :  { %v807_v3 = vpop.permute.xlu2 %806 }
 0xb84   :  { %1477 = vmatmul.msk.f32.gmra.mxu3 %vm183_vm13, %v807_v3 }
 0xbee   :  { %v829_v63 = vpop.f32.mrf.mxu3 }
 0xbef   :  { %v835_v0 = vadd.f32 %v829_v63, %v163_v62 }
 0xbf1   :  { %1590 = vtanh.f32 %v835_v0  ;;  %v1478_v18 = vmul.f32 -1.442695, %v835_v0  ;;  %v2121_v0 = vld [vmem:[%s2260_s4] ss:$0 sm:$0xff] }
 0xbf7   :  { %v1591_v2 = vpop.eup %1590 }
 0xbf8   :  { %881 = vrot.lane.b32.xlu0 %v1591_v2, %s1654_s23  ;;  %v168_v2 = vadd.f32 %v2121_v0, %v1843_v20 }
 0xc07   :  { %v832_v12 = vpop.f32.mrf.mxu3 }
 0xc08   :  { %v836_v14 = vadd.f32 %v832_v12, %v165_v46 }
 0xc0a   :  { %1592 = vtanh.f32 %v836_v14  ;;  %v1479_v1 = vmul.f32 -1.442695, %v836_v14  ;;  %v170_v14 = vadd.f32 %v2121_v0, %v1845_v21 }
 0xc0b   :  { %1594 = vpow2.f32 %v1478_v18 }
 0xc10   :  { %v1593_v17 = vpop.eup %1592 }
 0xc11   :  { %883 = vrot.lane.b32.xlu1 %v1593_v17, %s1654_s23  ;;  %v1595_v7 = vpop.eup %1594 }
 0xc12   :  { %v843_v19 = vadd.f32 1.0, %v1595_v7 }
 0xc14   :  { %1596 = vrcp.f32 %v843_v19  ;;  %v856_v11 = vand.u32 2147483648, %v843_v19  ;;  %vm850_vm5 = vweird.f32 %v843_v19  ;;  %v854_v31 = vand.u32 2147483647, %v843_v19 }
 0xc15   :  { %1598 = vpow2.f32 %v1479_v1 }
 0xc16   :  { %v857_v25 = vor.u32 1.1754944e-38, %v856_v11  ;;  %vm855_vm0 = vcmp.eq.f32.partialorder %v854_v31, 8.507059e+37 }
 0xc1a   :  { %v1597_v8 = vpop.eup %1596 }
 0xc1b   :  { %v846_v4 = vmul.f32 %v1597_v8, %v843_v19  ;;  %v1599_v10 = vpop.eup %1598  ;;  %vm851_vm4 = vweird.f32 %v1597_v8 }
 0xc1c   :  { %v844_v30 = vadd.f32 1.0, %v1599_v10  ;;  %vm852_vm6 = vmor %vm850_vm5, %vm851_vm4 }
 0xc1d   :  { %v847_v5 = vsub.f32 1.0, %v846_v4 }
 0xc1e   :  { %1600 = vrcp.f32 %v844_v30  ;;  %v871_v42 = vand.u32 2147483648, %v844_v30  ;;  %vm865_vm9 = vweird.f32 %v844_v30  ;;  %v869_v44 = vand.u32 2147483647, %v844_v30 }
 0xc1f   :  { %v848_v26 = vmul.f32 %v1597_v8, %v847_v5 }
 0xc20   :  { %v872_v45 = vor.u32 1.1754944e-38, %v871_v42  ;;  %vm870_vm11 = vcmp.eq.f32.partialorder %v869_v44, 8.507059e+37 }
 0xc21   :  { %v849_v9 = vadd.f32 %v1597_v8, %v848_v26 }
 0xc23   :  { %v853_v15 = vsel %vm852_vm6, %v1597_v8, %v849_v9 }
 0xc24   :  { %v858_v16 = vsel %vm855_vm0, %v857_v25, %v853_v15  ;;  %v1601_v36 = vpop.eup %1600 }
 0xc25   :  { %v861_v37 = vmul.f32 %v1601_v36, %v844_v30  ;;  %vm866_vm8 = vweird.f32 %v1601_v36  ;;  %v877_v24 = vmul.f32 %v858_v16, %v2082_v61 }
 0xc26   :  { %vm867_vm10 = vmor %vm865_vm9, %vm866_vm8 }
 0xc27   :  { %v862_v40 = vsub.f32 1.0, %v861_v37 }
 0xc29   :  { %v863_v29 = vmul.f32 %v1601_v36, %v862_v40 }
 0xc2b   :  { %v864_v33 = vadd.f32 %v1601_v36, %v863_v29 }
 0xc2d   :  { %v868_v27 = vsel %vm867_vm10, %v1601_v36, %v864_v33 }
 0xc2e   :  { %v873_v48 = vsel %vm870_vm11, %v872_v45, %v868_v27 }
 0xc2f   :  { %v878_v53 = vmul.f32 %v873_v48, %v2059_v41 }
 0xc6a   :  { %v882_v34 = vpop.permute.xlu0 %881 }
 0xc6b   :  { %v887_v35 = vmul.f32 %v882_v34, %v858_v16  ;;  %v2133_v34 = vld [vmem:[%s2261_s1] sm:$0xff] }
 0xc6c   :  { %vm1036_vm5 = vcmp.gt.s32.totalorder %v2133_v34, 6 }
 0xc6d   :  { %891 = vrot.lane.b32.xlu2 %v887_v35, %s1656_s24  ;;  %v1038_v35 = vsel %vm1036_vm5, 1, %v1655_v28 }
 0xc75   :  { %916 = vperm.xlu2 %1506, %v913_v39  }
 0xc83   :  { %v884_v56 = vpop.permute.xlu1 %883 }
 0xc84   :  { %v888_v49 = vmul.f32 %v884_v56, %v873_v48 }
 0xc86   :  { %893 = vrot.lane.b32.xlu0 %v888_v49, %s1656_s24 }
 0xcc7   :  { %v892_v38 = vpop.permute.xlu2 %891 }
 0xcc8   :  { %v2085_v43 = vadd.f32 %v892_v38, %v877_v24 }
 0xcca   :  { %1602 = vtanh.f32 %v2085_v43 }
 0xccf   :  { %v2096_v54 = vpop.permute.xlu2 %916 }
 0xcd0   :  { %v1603_v50 = vpop.eup %1602  ;;  %vm921_vm14 = vcmp.eq.s32.totalorder %v2096_v54, 1 }
 0xcd1   :  { %903 = vrot.lane.b32.xlu1 %v1603_v50, %s1654_s23  ;;  %v2142_v38 = vsel %vm921_vm14, %v2085_v43, %v2082_v61 }
 0xcd9   :  { %919 = vperm.xlu1 %1507, %v914_v60  }
 0xcf8   :  { %v894_v51 = vpop.permute.xlu0 %893 }
 0xcf9   :  { %v2092_v13 = vadd.f32 %v894_v51, %v878_v53 }
 0xcfb   :  { %1604 = vtanh.f32 %v2092_v13 }
 0xd01   :  { %v1605_v47 = vpop.eup %1604 }
 0xd02   :  { %905 = vrot.lane.b32.xlu0 %v1605_v47, %s1654_s23  ;;  %v1652_v47 = vld [vmem:[%s2261_s1 + $0x8] sm:$0xff] }
 0xd03   :  { %vm1037_vm9 = vcmp.gt.s32.totalorder %v1652_v47, 6  ;;  %vm1150_vm12 = vcmp.gt.s32.totalorder %v1652_v47, 7 }
 0xd43   :  { %v904_v6 = vpop.permute.xlu1 %903 }
 0xd44   :  { %v909_v32 = vmul.f32 %v904_v6, %v858_v16  ;;  %v1039_v6 = vsel %vm1037_vm9, 1, %v1655_v28 }
 0xd46   :  { %v2102_v52 = vsel %vm921_vm14, %v909_v32, %v2055_v55 }
 0xd47   :  { %929 = vrot.lane.b32.xlu2 %v2102_v52, %s1656_s24 }
 0xd4b   :  { %v2106_v57 = vpop.permute.xlu1 %919 }
 0xd4c   :  { %vm922_vm15 = vcmp.eq.s32.totalorder %v2106_v57, 1 }
 0xd4d   :  { %v2157_v61 = vsel %vm922_vm15, %v2092_v13, %v2059_v41 }
 0xd74   :  { %v906_v59 = vpop.permute.xlu0 %905 }
 0xd75   :  { %v910_v3 = vmul.f32 %v906_v59, %v873_v48 }
 0xd77   :  { %v2112_v62 = vsel %vm922_vm15, %v910_v3, %v2062_v58 }
 0xd78   :  { %931 = vrot.lane.b32.xlu0 %v2112_v62, %s1656_s24 }
 0xda1   :  { %v930_v63 = vpop.permute.xlu2 %929 }
 0xda2   :  { %1480 = vmatmul.msk.f32.vlgmr.msrb.gmra.mxu1 %vm183_vm13, %v930_v63 }
 0xdea   :  { %v932_v55 = vpop.permute.xlu0 %931 }
 0xdeb   :  { %1481 = vmatmul.msk.f32.gmra.mxu1 %vm183_vm13, %v932_v55 }
 0xe1f   :  { %v954_v46 = vpop.f32.mrf.mxu1 }
 0xe20   :  { %v960_v58 = vadd.f32 %v954_v46, %v168_v2 }
 0xe22   :  { %1606 = vtanh.f32 %v960_v58  ;;  %v1482_v7 = vmul.f32 -1.442695, %v960_v58  ;;  %v1152_v58 = vsel %vm1150_vm12, 1, %v1655_v28 }
 0xe28   :  { %v1607_v12 = vpop.eup %1606 }
 0xe29   :  { %1006 = vrot.lane.b32.xlu1 %v1607_v12, %s1654_s23 }
 0xe68   :  { %v957_v17 = vpop.f32.mrf.mxu1 }
 0xe69   :  { %v961_v18 = vadd.f32 %v957_v17, %v170_v14  ;;  %v175_v17 = vadd.f32 %v2121_v0, %v1849_v23 }
 0xe6b   :  { %1608 = vtanh.f32 %v961_v18  ;;  %v1483_v16 = vmul.f32 -1.442695, %v961_v18 }
 0xe6c   :  { %1610 = vpow2.f32 %v1482_v7 }
 0xe71   :  { %v1609_v19 = vpop.eup %1608 }
 0xe72   :  { %1008 = vrot.lane.b32.xlu2 %v1609_v19, %s1654_s23  ;;  %v1611_v8 = vpop.eup %1610 }
 0xe73   :  { %v968_v1 = vadd.f32 1.0, %v1611_v8 }
 0xe75   :  { %1612 = vrcp.f32 %v968_v1  ;;  %v981_v30 = vand.u32 2147483648, %v968_v1  ;;  %vm975_vm2 = vweird.f32 %v968_v1  ;;  %v979_v21 = vand.u32 2147483647, %v968_v1 }
 0xe76   :  { %1614 = vpow2.f32 %v1483_v16  ;;  %v1167_v16 = vld [vmem:[%s2262_s5 + $0x20] sm:$0xff] }
 0xe77   :  { %v982_v11 = vor.u32 1.1754944e-38, %v981_v30  ;;  %vm980_vm4 = vcmp.eq.f32.partialorder %v979_v21, 8.507059e+37 }
 0xe7b   :  { %v1613_v20 = vpop.eup %1612 }
 0xe7c   :  { %v971_v4 = vmul.f32 %v1613_v20, %v968_v1  ;;  %vm976_vm1 = vweird.f32 %v1613_v20  ;;  %v1615_v36 = vpop.eup %1614 }
 0xe7d   :  { %vm977_vm3 = vmor %vm975_vm2, %vm976_vm1  ;;  %v969_v37 = vadd.f32 1.0, %v1615_v36  ;;  %v1163_v36 = vld [vmem:[%s2262_s5] sm:$0xff] }
 0xe7e   :  { %v972_v5 = vsub.f32 1.0, %v971_v4 }
 0xe7f   :  { %1616 = vrcp.f32 %v969_v37  ;;  %v996_v44 = vand.u32 2147483648, %v969_v37  ;;  %vm990_vm0 = vweird.f32 %v969_v37  ;;  %v994_v27 = vand.u32 2147483647, %v969_v37 }
 0xe80   :  { %v973_v26 = vmul.f32 %v1613_v20, %v972_v5 }
 0xe81   :  { %v997_v56 = vor.u32 1.1754944e-38, %v996_v44  ;;  %vm995_vm8 = vcmp.eq.f32.partialorder %v994_v27, 8.507059e+37  ;;  %v1170_v44 = vld [vmem:[%s2262_s5 + $0x38] sm:$0xff]  ;;  %v1168_v27 = vld [vmem:[%s2262_s5 + $0x28] sm:$0xff] }
 0xe82   :  { %v974_v10 = vadd.f32 %v1613_v20, %v973_v26 }
 0xe84   :  { %v978_v9 = vsel %vm977_vm3, %v1613_v20, %v974_v10 }
 0xe85   :  { %v983_v15 = vsel %vm980_vm4, %v982_v11, %v978_v9  ;;  %v1617_v39 = vpop.eup %1616  ;;  %vm1149_vm4 = vcmp.gt.s32.totalorder %v2133_v34, 7 }
 0xe86   :  { %v986_v40 = vmul.f32 %v1617_v39, %v969_v37  ;;  %vm991_vm6 = vweird.f32 %v1617_v39  ;;  %v1002_v50 = vmul.f32 %v983_v15, %v2142_v38 }
 0xe87   :  { %vm992_vm7 = vmor %vm990_vm0, %vm991_vm6 }
 0xe88   :  { %v987_v29 = vsub.f32 1.0, %v986_v40 }
 0xe8a   :  { %v988_v33 = vmul.f32 %v1617_v39, %v987_v29 }
 0xe8c   :  { %v989_v42 = vadd.f32 %v1617_v39, %v988_v33 }
 0xe8e   :  { %v993_v45 = vsel %vm992_vm7, %v1617_v39, %v989_v42 }
 0xe8f   :  { %v998_v49 = vsel %vm995_vm8, %v997_v56, %v993_v45  ;;  %v1166_v45 = vld [vmem:[%s2262_s5 + $0x18] sm:$0xff]  ;;  %v1164_v56 = vld [vmem:[%s2262_s5 + $0x8] sm:$0xff] }
 0xe90   :  { %v1003_v43 = vmul.f32 %v998_v49, %v2157_v61 }
 0xe9b   :  { %v1007_v31 = vpop.permute.xlu1 %1006 }
 0xe9c   :  { %v1012_v25 = vmul.f32 %v1007_v31, %v983_v15 }
 0xe9e   :  { %1016 = vrot.lane.b32.xlu0 %v1012_v25, %s1656_s24  ;;  %v1169_v25 = vld [vmem:[%s2262_s5 + $0x30] sm:$0xff] }
 0xe9f   :  { %1194 = vmatpush.msra.mxu3 %v1169_v25 }
 0xea1   :  { %1195 = vmatpush.msra.mxu3 %v1167_v16 }
 0xea6   :  { %1041 = vperm.xlu0 %1508, %v1038_v35   ;;  %v1165_v35 = vld [vmem:[%s2262_s5 + $0x10] sm:$0xff] }
 0xea7   :  { %1196 = vmatpush.msra.mxu3 %v1165_v35 }
 0xea9   :  { %1197 = vmatpush.msra.mxu3 %v1163_v36 }
 0xeab   :  { %1214 = vmatpush.msrb.mxu3 %v1170_v44 }
 0xead   :  { %1215 = vmatpush.msrb.mxu3 %v1168_v27 }
 0xeaf   :  { %1216 = vmatpush.msrb.mxu3 %v1166_v45 }
 0xeb1   :  { %1217 = vmatpush.msrb.mxu3 %v1164_v56 }
 0xecc   :  { %v1009_v48 = vpop.permute.xlu2 %1008 }
 0xecd   :  { %v1013_v24 = vmul.f32 %v1009_v48, %v998_v49 }
 0xecf   :  { %1018 = vrot.lane.b32.xlu1 %v1013_v24, %s1656_s24 }
 0xf10   :  { %v1017_v60 = vpop.permute.xlu0 %1016 }
 0xf11   :  { %v2145_v53 = vadd.f32 %v1017_v60, %v1002_v50 }
 0xf13   :  { %1618 = vtanh.f32 %v2145_v53 }
 0xf18   :  { %v2161_v3 = vpop.permute.xlu0 %1041 }
 0xf19   :  { %v1619_v51 = vpop.eup %1618  ;;  %vm1046_vm10 = vcmp.eq.s32.totalorder %v2161_v3, 1 }
 0xf1a   :  { %1028 = vrot.lane.b32.xlu2 %v1619_v51, %s1654_s23  ;;  %v1224_v51 = vld [vmem:[%s2264_s7] sm:$0x3]  ;;  %v1048_v36 = vsel %vm1046_vm10, %v2145_v53, %v2142_v38 }
 0xf22   :  { %1044 = vperm.xlu2 %1506, %v1039_v6   ;;  %v1226_v6 = vperm.slane %v1224_v51, 0 }
 0xf41   :  { %v1019_v54 = vpop.permute.xlu1 %1018 }
 0xf42   :  { %v1023_v32 = vadd.f32 %v1019_v54, %v1003_v43 }
 0xf44   :  { %1620 = vtanh.f32 %v1023_v32 }
 0xf4a   :  { %v1621_v59 = vpop.eup %1620 }
 0xf4b   :  { %1030 = vrot.lane.b32.xlu1 %v1621_v59, %s1654_s23 }
 0xf74   :  { %v1029_v63 = vpop.permute.xlu2 %1028 }
 0xf75   :  { %v1034_v55 = vmul.f32 %v1029_v63, %v983_v15 }
 0xf77   :  { %v1050_v57 = vsel %vm1046_vm10, %v1034_v55, %v2102_v52  ;;  %v1227_v55 = vperm.slane %v1224_v51, 1 }
 0xf78   :  { %1054 = vrot.lane.b32.xlu0 %v1050_v57, %s1656_s24 }
 0xf7c   :  { %v1045_v41 = vpop.permute.xlu2 %1044 }
 0xf7d   :  { %vm1047_vm11 = vcmp.eq.s32.totalorder %v1045_v41, 1 }
 0xf7e   :  { %v1049_v37 = vsel %vm1047_vm11, %v1023_v32, %v2157_v61  ;;  %v173_v61 = vadd.f32 %v2121_v0, %v1847_v22  ;;  %v1151_v22 = vsel %vm1149_vm4, 1, %v1655_v28  ;;  %vm1325_vm4 = vcmask 523520  }
 0xfbd   :  { %v1031_v13 = vpop.permute.xlu1 %1030 }
 0xfbe   :  { %v1035_v2 = vmul.f32 %v1031_v13, %v998_v49  ;;  %v1171_v49 = vld [vmem:[%s2263_s6] sm:$0x3] }
 0xfbf   :  { %v1176_v24 = vperm.slane %v1171_v49, 0  ;;  %v1177_v47 = vperm.slane %v1171_v49, 1 }
 0xfc0   :  { %v1051_v46 = vsel %vm1047_vm11, %v1035_v2, %v2112_v62 }
 0xfc1   :  { %1056 = vrot.lane.b32.xlu1 %v1051_v46, %s1656_s24 }
 0xfc9   :  { %1157 = vperm.xlu1 %1507, %v1152_v58  }
 0xfea   :  { %v1055_v12 = vpop.permute.xlu0 %1054 }
 0xfeb   :  { %1484 = vmatmul.msk.f32.vlgmr.msrb.gmra.mxu2 %vm183_vm13, %v1055_v12 }
0x1033   :  { %v1057_v14 = vpop.permute.xlu1 %1056 }
0x1034   :  { %1485 = vmatmul.msk.f32.gmra.mxu2 %vm183_vm13, %v1057_v14 }
0x103b   :  { %v1158_v39 = vpop.permute.xlu1 %1157 }
0x103c   :  { %vm1160_vm3 = vcmp.eq.s32.totalorder %v1158_v39, 1 }
0x106e   :  { %v2174_v52 = vpop.f32.mrf.mxu2 }
0x106f   :  { %v1085_v32 = vadd.f32 %v2174_v52, %v173_v61 }
0x1071   :  { %v1486_v0 = vmul.f32 -1.442695, %v1085_v32 }
0x10b7   :  { %v1082_v18 = vpop.f32.mrf.mxu2 }
0x10b8   :  { %v1086_v7 = vadd.f32 %v1082_v18, %v175_v17 }
0x10ba   :  { %1622 = vtanh.f32 %v1086_v7  ;;  %v1487_v19 = vmul.f32 -1.442695, %v1086_v7 }
0x10bc   :  { %1624 = vpow2.f32 %v1487_v19 }
0x10c0   :  { %v1623_v62 = vpop.eup %1622 }
0x10c1   :  { %1133 = vrot.lane.b32.xlu2 %v1623_v62, %s1654_s23 }
0x10c2   :  { %v1625_v8 = vpop.eup %1624 }
0x10c3   :  { %v1094_v1 = vadd.f32 1.0, %v1625_v8 }
0x10c5   :  { %1626 = vrcp.f32 %v1094_v1  ;;  %v1121_v30 = vand.u32 2147483648, %v1094_v1  ;;  %vm1115_vm15 = vweird.f32 %v1094_v1  ;;  %v1119_v23 = vand.u32 2147483647, %v1094_v1 }
0x10c7   :  { %v1122_v9 = vor.u32 1.1754944e-38, %v1121_v30  ;;  %vm1120_vm2 = vcmp.eq.f32.partialorder %v1119_v23, 8.507059e+37 }
0x10cb   :  { %v1627_v20 = vpop.eup %1626 }
0x10cc   :  { %v1111_v4 = vmul.f32 %v1627_v20, %v1094_v1  ;;  %vm1116_vm14 = vweird.f32 %v1627_v20 }
0x10cd   :  { %vm1117_vm1 = vmor %vm1115_vm15, %vm1116_vm14 }
0x10ce   :  { %v1112_v5 = vsub.f32 1.0, %v1111_v4 }
0x10d0   :  { %v1113_v26 = vmul.f32 %v1627_v20, %v1112_v5 }
0x10d2   :  { %v1114_v10 = vadd.f32 %v1627_v20, %v1113_v26 }
0x10d4   :  { %v1118_v21 = vsel %vm1117_vm1, %v1627_v20, %v1114_v10  ;;  %v14_v20 = vstv %s2265_s8 }
0x10d5   :  { %v1123_v31 = vsel %vm1120_vm2, %v1122_v9, %v1118_v21  ;;  %15 = vst [vmem:[#allocation2] sm:$0x1] %v14_v20 }
0x10d6   :  { %v1128_v40 = vmul.f32 %v1123_v31, %v1049_v37 }
0x10dc   :  { %v1390_v35 = vld [vmem:[#allocation2] sm:$0x1] }
0x111b   :  { %v1134_v11 = vpop.permute.xlu2 %1133 }
0x111c   :  { %v1138_v15 = vmul.f32 %v1134_v11, %v1123_v31 }
0x111e   :  { %1143 = vrot.lane.b32.xlu0 %v1138_v15, %s1656_s24 }
0x1190   :  { %v1144_v29 = vpop.permute.xlu0 %1143 }
0x1191   :  { %v1148_v33 = vadd.f32 %v1144_v29, %v1128_v40 }
0x1193   :  { %v2194_v42 = vsel %vm1160_vm3, %v1148_v33, %v1049_v37 }
0x1194   :  { %1173 = vrot.lane.b32.xlu2 %v2194_v42, %s1657_s10 }
0x11ee   :  { %v1174_v48 = vpop.permute.xlu2 %1173 }
0x11ef   :  { %1488 = vmatmul.msk.f32.vlgmr.msra.gmra.mxu3 %vm183_vm13, %v1174_v48 }
0x11f7   :  { %1489 = vmatmul.msk.f32.vlgmr.msrb.gmra.mxu3 %vm183_vm13, %v1174_v48  ;;  %v1280_v48 = vlaneseq }
0x11f9   :  { %v1281_v49 = vshrl.u32 %v1280_v48, 7 }
0x11fb   :  { %vm1283_vm9 = vcmp.lt.s32.totalorder %v1281_v49, 4  ;;  %vm1335_vm10 = vcmp.ge.s32.totalorder %v1281_v49, 4 }
0x1272   :  { %v1199_v50 = vpop.f32.mrf.mxu3 }
0x1273   :  { %v1200_v60 = vadd.f32 %v1199_v50, %v1176_v24 }
0x1275   :  { %1628 = vtanh.f32 %v1200_v60 }
0x127a   :  { %v1219_v43 = vpop.f32.mrf.mxu3 }
0x127b   :  { %v1629_v54 = vpop.eup %1628  ;;  %v1220_v59 = vadd.f32 %v1219_v43, %v1177_v47 }
0x127c   :  { %v1230_v63 = vmul.f32 %v1629_v54, %v1226_v6 }
0x127d   :  { %1630 = vtanh.f32 %v1220_v59 }
0x127e   :  { %1241 = vrot.lane.b32.xlu2 %v1230_v63, %s1656_s24  ;;  %1237 = vrot.lane.b32.xlu1 %v1230_v63, %s1654_s23  ;;  %1632 = vtanh.f32 %v1085_v32 }
0x127f   :  { %1233 = vrot.lane.b32.xlu0 %v1230_v63, %s1657_s10  ;;  %1634 = vpow2.f32 %v1486_v0 }
0x1283   :  { %v1631_v57 = vpop.eup %1630 }
0x1284   :  { %v1231_v41 = vmul.f32 %v1631_v57, %v1227_v55  ;;  %v1633_v13 = vpop.eup %1632 }
0x1285   :  { %v1635_v2 = vpop.eup %1634 }
0x1286   :  { %1131 = vrot.lane.b32.xlu2 %v1633_v13, %s1654_s23  ;;  %1251 = vrot.lane.b32.xlu1 %v1231_v41, %s1654_s23  ;;  %v1093_v46 = vadd.f32 1.0, %v1635_v2 }
0x1287   :  { %1247 = vrot.lane.b32.xlu0 %v1231_v41, %s1657_s10 }
0x1288   :  { %1636 = vrcp.f32 %v1093_v46  ;;  %v1106_v7 = vand.u32 2147483648, %v1093_v46  ;;  %vm1100_vm6 = vweird.f32 %v1093_v46  ;;  %v1104_v34 = vand.u32 2147483647, %v1093_v46 }
0x128a   :  { %v1107_v62 = vor.u32 1.1754944e-38, %v1106_v7  ;;  %vm1105_vm7 = vcmp.eq.f32.partialorder %v1104_v34, 8.507059e+37 }
0x128e   :  { %1154 = vperm.xlu2 %1506, %v1151_v22   ;;  %v1637_v58 = vpop.eup %1636 }
0x128f   :  { %1255 = vrot.lane.b32.xlu0 %v1231_v41, %s1656_s24  ;;  %v1096_v12 = vmul.f32 %v1637_v58, %v1093_v46  ;;  %vm1101_vm5 = vweird.f32 %v1637_v58 }
0x1290   :  { %vm1102_vm0 = vmor %vm1100_vm6, %vm1101_vm5  ;;  %vm1403_vm5 = vcmask 253952  }
0x1291   :  { %v1097_v14 = vsub.f32 1.0, %v1096_v12 }
0x1293   :  { %v1098_v52 = vmul.f32 %v1637_v58, %v1097_v14 }
0x1295   :  { %v1099_v18 = vadd.f32 %v1637_v58, %v1098_v52 }
0x1297   :  { %v1103_v28 = vsel %vm1102_vm0, %v1637_v58, %v1099_v18 }
0x1298   :  { %v1108_v19 = vsel %vm1105_vm7, %v1107_v62, %v1103_v28 }
0x1299   :  { %v1127_v39 = vmul.f32 %v1108_v19, %v1048_v36 }
0x12d8   :  { %v1242_v17 = vpop.permute.xlu2 %1241 }
0x12e0   :  { %v1132_v8 = vpop.permute.xlu2 %1131 }
0x12e1   :  { %v1137_v1 = vmul.f32 %v1132_v8, %v1108_v19 }
0x12e3   :  { %1141 = vrot.lane.b32.xlu1 %v1137_v1, %s1656_s24 }
0x12e8   :  { %v1155_v40 = vpop.permute.xlu2 %1154 }
0x12e9   :  { %vm1159_vm8 = vcmp.eq.s32.totalorder %v1155_v40, 1 }
0x12f0   :  { %v1238_v26 = vpop.permute.xlu1 %1237 }
0x12f1   :  { %v1234_v4 = vpop.permute.xlu0 %1233 }
0x12f2   :  { %v1236_v5 = vadd.f32 %v1234_v4, %v1230_v63 }
0x12f4   :  { %v1240_v10 = vadd.f32 %v1238_v26, %v1236_v5 }
0x12f6   :  { %v1244_v30 = vadd.f32 %v1242_v17, %v1240_v10 }
0x12f8   :  { %v1245_v23 = vadd.f32 %v1244_v30, %v1231_v41  ;;  %v1252_v11 = vpop.permute.xlu1 %1251 }
0x12f9   :  { %v1248_v21 = vpop.permute.xlu0 %1247 }
0x12fa   :  { %v1250_v9 = vadd.f32 %v1248_v21, %v1245_v23 }
0x12fc   :  { %v1254_v31 = vadd.f32 %v1252_v11, %v1250_v9 }
0x1301   :  { %v1256_v15 = vpop.permute.xlu0 %1255 }
0x1302   :  { %v1258_v25 = vadd.f32 %v1256_v15, %v1254_v31 }
0x1304   :  { %v1259_v16 = vperm.slane %v1258_v25, 0 }
0x1306   :  { %1261 = vrot.lane.b32.xlu0 %v1259_v16, %s1656_s24 }
0x130e   :  { %1393 = vperm.xlu0 %1508, %v1390_v35  }
0x1355   :  { %v1142_v37 = vpop.permute.xlu1 %1141 }
0x1356   :  { %v1147_v29 = vadd.f32 %v1142_v37, %v1127_v39 }
0x1358   :  { %v2239_v44 = vsel %vm1159_vm8, %v1147_v29, %v1048_v36 }
0x1378   :  { %v1262_v33 = vpop.permute.xlu0 %1261 }
0x1379   :  { %v1264_v27 = vmul.f32 %v1262_v33, %v2239_v44 }
0x137b   :  { %1268 = vrot.lane.b32.xlu1 %v1264_v27, %s1657_s10 }
0x13ed   :  { %v1269_v45 = vpop.permute.xlu1 %1268 }
0x13ee   :  { %v1274_v56 = vsel %vm183_vm13, %v1269_v45, 0.0 }
0x13ef   :  { %1275 = vadd.xlane.f32.xlu2 %v1274_v56 }
0x1462   :  { %v1276_v38 = vpop.xlane.xlu2 %1275 }
0x1463   :  { %v1285_v53 = vsel %vm1283_vm9, %v1276_v38, -1e+30  ;;  %v1341_v3 = vsel %vm1335_vm10, %v1276_v38, -1e+30 }
0x1464   :  { %v1287_v24 = vmax.f32 %v1285_v53, -1e+30  ;;  %v1343_v50 = vmax.f32 %v1341_v3, -1e+30 }
0x1466   :  { %v1288_v60 = vrot.slane %v1287_v24, 4  ;;  %v1344_v51 = vrot.slane %v1343_v50, 4 }
0x1468   :  { %v1289_v47 = vmax.f32 %v1287_v24, %v1288_v60  ;;  %v1345_v6 = vmax.f32 %v1343_v50, %v1344_v51 }
0x146a   :  { %v1290_v61 = vrot.slane %v1289_v47, 2  ;;  %v1346_v43 = vrot.slane %v1345_v6, 2 }
0x146c   :  { %v1291_v54 = vmax.f32 %v1289_v47, %v1290_v61  ;;  %v1347_v32 = vmax.f32 %v1345_v6, %v1346_v43 }
0x146e   :  { %v1292_v59 = vrot.slane %v1291_v54, 1  ;;  %v1348_v63 = vrot.slane %v1347_v32, 1 }
0x1470   :  { %v1293_v55 = vmax.f32 %v1291_v54, %v1292_v59  ;;  %v1349_v57 = vmax.f32 %v1347_v32, %v1348_v63 }
0x1472   :  { %v1294_v41 = vsub.f32 %v1285_v53, %v1293_v55  ;;  %v1295_v13 = vsub.f32 -1e+30, %v1293_v55  ;;  %v1350_v22 = vsub.f32 %v1341_v3, %v1349_v57  ;;  %v1351_v0 = vsub.f32 -1e+30, %v1349_v57 }
0x1474   :  { %v1296_v2 = vmul.f32 1.442695, %v1294_v41  ;;  %v1298_v46 = vmul.f32 1.442695, %v1295_v13  ;;  %v1352_v58 = vmul.f32 1.442695, %v1350_v22  ;;  %v1394_v41 = vpop.permute.xlu0 %1393 }
0x1475   :  { %v1354_v12 = vmul.f32 1.442695, %v1351_v0 }
0x1476   :  { %1638 = vpow2.f32 %v1296_v2  ;;  %v1396_v2 = vperm.slane %v1394_v41, 0 }
0x1477   :  { %1640 = vpow2.f32 %v1298_v46 }
0x1478   :  { %1642 = vpow2.f32 %v1352_v58 }
0x1479   :  { %1644 = vpow2.f32 %v1354_v12 }
0x147c   :  { %v1639_v14 = vpop.eup %1638 }
0x147d   :  { %v1641_v52 = vpop.eup %1640 }
0x147e   :  { %v1643_v17 = vpop.eup %1642  ;;  %v1300_v18 = vadd.f32 %v1641_v52, %v1639_v14 }
0x147f   :  { %v1645_v7 = vpop.eup %1644 }
0x1480   :  { %v1301_v34 = vrot.slane %v1300_v18, 4  ;;  %v1356_v28 = vadd.f32 %v1645_v7, %v1643_v17 }
0x1482   :  { %v1302_v62 = vadd.f32 %v1301_v34, %v1300_v18  ;;  %v1357_v19 = vrot.slane %v1356_v28, 4 }
0x1484   :  { %v1303_v8 = vrot.slane %v1302_v62, 2  ;;  %v1358_v1 = vadd.f32 %v1357_v19, %v1356_v28 }
0x1486   :  { %v1304_v20 = vadd.f32 %v1303_v8, %v1302_v62  ;;  %v1359_v4 = vrot.slane %v1358_v1, 2 }
0x1488   :  { %v1305_v5 = vrot.slane %v1304_v20, 1  ;;  %v1360_v26 = vadd.f32 %v1359_v4, %v1358_v1 }
0x148a   :  { %v1306_v10 = vadd.f32 %v1305_v5, %v1304_v20  ;;  %v1361_v30 = vrot.slane %v1360_v26, 1 }
0x148c   :  { %1646 = vrcp.f32 %v1306_v10  ;;  %v1362_v23 = vadd.f32 %v1361_v30, %v1360_v26  ;;  %v1318_v15 = vand.u32 2147483648, %v1306_v10  ;;  %v1316_v35 = vand.u32 2147483647, %v1306_v10 }
0x148d   :  { %vm1312_vm11 = vweird.f32 %v1306_v10 }
0x148e   :  { %1648 = vrcp.f32 %v1362_v23  ;;  %v1374_v39 = vand.u32 2147483648, %v1362_v23  ;;  %v1319_v40 = vor.u32 1.1754944e-38, %v1318_v15  ;;  %v1372_v33 = vand.u32 2147483647, %v1362_v23 }
0x148f   :  { %vm1317_vm15 = vcmp.eq.f32.partialorder %v1316_v35, 8.507059e+37  ;;  %vm1368_vm1 = vweird.f32 %v1362_v23 }
0x1490   :  { %v1375_v38 = vor.u32 1.1754944e-38, %v1374_v39  ;;  %vm1373_vm3 = vcmp.eq.f32.partialorder %v1372_v33, 8.507059e+37 }
0x1492   :  { %v1647_v21 = vpop.eup %1646 }
0x1493   :  { %v1308_v9 = vmul.f32 %v1647_v21, %v1306_v10  ;;  %vm1313_vm13 = vweird.f32 %v1647_v21 }
0x1494   :  { %v1649_v11 = vpop.eup %1648  ;;  %vm1314_vm12 = vmor %vm1312_vm11, %vm1313_vm13 }
0x1495   :  { %v1309_v31 = vsub.f32 1.0, %v1308_v9  ;;  %v1364_v25 = vmul.f32 %v1649_v11, %v1362_v23  ;;  %vm1369_vm14 = vweird.f32 %v1649_v11 }
0x1496   :  { %vm1370_vm2 = vmor %vm1368_vm1, %vm1369_vm14 }
0x1497   :  { %v1310_v16 = vmul.f32 %v1647_v21, %v1309_v31  ;;  %v1365_v36 = vsub.f32 1.0, %v1364_v25 }
0x1499   :  { %v1311_v37 = vadd.f32 %v1647_v21, %v1310_v16  ;;  %v1366_v29 = vmul.f32 %v1649_v11, %v1365_v36 }
0x149b   :  { %v1315_v27 = vsel %vm1314_vm12, %v1647_v21, %v1311_v37  ;;  %v1367_v56 = vadd.f32 %v1649_v11, %v1366_v29 }
0x149c   :  { %v1320_v45 = vsel %vm1317_vm15, %v1319_v40, %v1315_v27 }
0x149d   :  { %v1321_v48 = vmul.f32 %v1639_v14, %v1320_v45  ;;  %v1322_v49 = vmul.f32 %v1641_v52, %v1320_v45  ;;  %v1371_v53 = vsel %vm1370_vm2, %v1649_v11, %v1367_v56  ;;  %v1397_v52 = vmul.f32 %v1396_v2, %v2194_v42 }
0x149e   :  { %v1376_v50 = vsel %vm1373_vm3, %v1375_v38, %v1371_v53 }
0x149f   :  { %v1323_v3 = vmul.f32 %v1321_v48, %v2239_v44  ;;  %v1324_v24 = vmul.f32 %v1322_v49, %v2194_v42  ;;  %v1377_v60 = vmul.f32 %v1643_v17, %v1376_v50  ;;  %v1378_v51 = vmul.f32 %v1645_v7, %v1376_v50 }
0x14a1   :  { %v1326_v47 = vsel %vm1325_vm4, %v1323_v3, 0.0  ;;  %v1327_v6 = vsel %vm1325_vm4, %v1324_v24, 0.0  ;;  %v1379_v61 = vmul.f32 %v1377_v60, %v2239_v44  ;;  %v1380_v43 = vmul.f32 %v1378_v51, %v2194_v42 }
0x14a2   :  { %v1328_v54 = vadd.f32 %v1327_v6, %v1326_v47 }
0x14a3   :  { %v1381_v32 = vsel %vm1325_vm4, %v1379_v61, 0.0  ;;  %v1382_v59 = vsel %vm1325_vm4, %v1380_v43, 0.0 }
0x14a4   :  { %v1329_v63 = vrot.slane %v1328_v54, 4  ;;  %v1383_v55 = vadd.f32 %v1382_v59, %v1381_v32 }
0x14a6   :  { %v1330_v57 = vadd.f32 %v1329_v63, %v1328_v54  ;;  %v1384_v13 = vrot.slane %v1383_v55, 4 }
0x14a8   :  { %v1331_v22 = vrot.slane %v1330_v57, 2  ;;  %v1385_v0 = vadd.f32 %v1384_v13, %v1383_v55 }
0x14aa   :  { %v1332_v46 = vadd.f32 %v1331_v22, %v1330_v57  ;;  %v1386_v58 = vrot.slane %v1385_v0, 2 }
0x14ac   :  { %v1333_v12 = vrot.slane %v1332_v46, 1  ;;  %v1387_v14 = vadd.f32 %v1386_v58, %v1385_v0 }
0x14ae   :  { %v1334_v44 = vadd.f32 %v1333_v12, %v1332_v46  ;;  %v1388_v17 = vrot.slane %v1387_v14, 1 }
0x14b0   :  { %v1398_v18 = vadd.f32 %v1397_v52, %v1334_v44  ;;  %v1389_v7 = vadd.f32 %v1388_v17, %v1387_v14 }
0x14b2   :  { %1400 = vrot.lane.b32.xlu1 %v1398_v18, %s1657_s10  ;;  %1406 = vrot.lane.b32.xlu0 %v1389_v7, %s1657_s10 }
0x1524   :  { %v1401_v34 = vpop.permute.xlu1 %1400  ;;  %v1407_v28 = vpop.permute.xlu0 %1406 }
0x1525   :  { %1404 = vst.msk [vmem:[%s2266_s9] sm:$0x1] %vm1403_vm5, %v1401_v34 }
0x1526   :  { %1409 = vst.msk [vmem:[%s2266_s9 + $0x1] sm:$0x1] %vm1403_vm5, %v1407_v28 }

</bundles_post_ra>
